<compile_context>
chip_gen: v6e
topology: v6e:2x2x1
jax: 0.10.0
libtpu: 0.0.40
codegen_flags: <defaults>
</compile_context>

<pallas_src>
import math
import functools

import jax
import jax.numpy as jnp
from jax.experimental import pallas as pl
from jax.experimental.pallas import tpu as pltpu

LOG2PI = math.log(2.0 * math.pi)
LN2 = 0.69314718056
TEMP = 0.3                      # RelaxedBernoulli temperature (sample_DAG / sample_bipartite)
SQRT2 = math.sqrt(2.0)

_VMEM = pl.BlockSpec(memory_space=pltpu.MemorySpace.VMEM)
_SMEM = pl.BlockSpec(memory_space=pltpu.MemorySpace.SMEM)


# ----------------------------------------------------------------------------
# In-kernel math helpers (VPU/EUP-only ops: exp / log / where / mul / add)
# ----------------------------------------------------------------------------
def _std_normal_log_cdf(x):
    # log Phi(x) with erf via Abramowitz & Stegun 7.1.26 (|abs err| < 1.5e-7).
    # TODO(synk): exact lax.erf is avoided to guarantee Mosaic lowering.
    a1, a2, a3, a4, a5 = 0.254829592, -0.284496736, 1.421413741, -1.453152027, 1.061405429
    p = 0.3275911
    xs = x * (1.0 / SQRT2)
    ax = jnp.abs(xs)
    t = 1.0 / (1.0 + p * ax)
    poly = ((((a5 * t + a4) * t + a3) * t + a2) * t + a1) * t
    erf_abs = 1.0 - poly * jnp.exp(-ax * ax)
    erf = jnp.where(xs >= 0.0, erf_abs, -erf_abs)
    phi = 0.5 * (1.0 + erf)
    return jnp.log(jnp.maximum(phi, 1e-12))


def _normal_logprob(x, mean, logscale):
    # FNP Normal: parameterised by mean and log-scale.
    return -logscale - 0.5 * LOG2PI - 0.5 * (x - mean) * (x - mean) * jnp.exp(-2.0 * logscale)


def _logitexp(logp):
    # logit of exp(logp), numerically split at log(0.5) (matches FNP's logitexp).
    pos = jnp.maximum(logp, -LN2)
    neg = jnp.minimum(logp, -LN2)
    neg_val = neg - jnp.log(1.0 - jnp.exp(neg))
    pos_val = -jnp.log(jnp.maximum(jnp.exp(-pos) - 1.0, 1e-20))
    return jnp.where(logp > -LN2, pos_val, neg_val)


def _sum11(x):
    # Full reduction kept 2-D ((1,1)) for robust Mosaic lowering.
    return jnp.sum(jnp.sum(x, axis=1, keepdims=True), axis=0, keepdims=True)


# ----------------------------------------------------------------------------
# Fused forward kernel
# ----------------------------------------------------------------------------
def _fnp2_fused_kernel(nR, nM, dim_x, dim_y, dim_u, dim_z, num_M,
                       scale_ref,                                   # SMEM (1,1): exp(pairwise_g_logscale)
                       x_ref, y_ref, eps_ref, unif_ref,             # data + noise
                       w1_ref, b1_ref, wenc_ref, benc_ref,          # cond_trans, fused [p_u|q_z]
                       tyw_ref, tyb_ref,                            # trans_cond_y
                       o1w_ref, o1b_ref, o2w_ref, o2b_ref,          # output head
                       ypack_ref, loss_ref):
    f32 = jnp.float32
    N = nR + nM

    x = x_ref[...]                                                  # (N, dim_x)

    # ---- encoder:  H = relu(X W1 + b1);  [pu_mean|pu_logstd|qz_mean|qz_logstd] = H Wenc + benc
    h = jnp.maximum(jnp.dot(x, w1_ref[...], preferred_element_type=f32) + b1_ref[...], 0.0)
    enc = jnp.dot(h, wenc_ref[...], preferred_element_type=f32) + benc_ref[...]
    pu_mean = enc[:, :dim_u]
    pu_logscale = enc[:, dim_u:2 * dim_u]
    qz_mean = enc[:, 2 * dim_u:2 * dim_u + dim_z]
    qz_logscale = enc[:, 2 * dim_u + dim_z:]

    # ---- reparameterised samples u ~ p_u, z ~ q_z
    eps = eps_ref[...]                                              # (N, dim_u+dim_z) ~ N(0,1)
    u = pu_mean + jnp.exp(pu_logscale) * eps[:, :dim_u]
    z = qz_mean + jnp.exp(qz_logscale) * eps[:, dim_u:]
    uR = u[:nR, :]

    # ---- pairwise squared distances of every row of u against the reference rows
    #      d2 = ||u_i||^2 + ||uR_j||^2 - 2 u_i.uR_j   (trans-B dot_general, no transpose input)
    cross = jax.lax.dot_general(u, uR, (((1,), (1,)), ((), ())),
                                preferred_element_type=f32)          # (N, nR)
    rr = jnp.sum(u * u, axis=1, keepdims=True)                       # (N, 1)
    ones_row = jnp.ones((1, dim_u), f32)
    cc = jax.lax.dot_general(ones_row, uR * uR, (((1,), (1,)), ((), ())),
                             preferred_element_type=f32)             # (1, nR)
    d2 = jnp.maximum(rr + cc - 2.0 * cross, 0.0)
    logits = _logitexp((-0.5) * d2 / scale_ref[0, 0])                # pairwise_g logits

    # ---- DAG mask: edge i->j iff ordering(i) < ordering(j), ordering = sum log Phi(uR)
    logphi = _std_normal_log_cdf(u)                                  # (N, dim_u)
    ord_rows = jnp.sum(logphi, axis=1, keepdims=True)                # (N, 1)  (rows >= nR unused)
    ord_cols = jax.lax.dot_general(jnp.ones((1, dim_u), f32), logphi[:nR, :],
                                   (((1,), (1,)), ((), ())),
                                   preferred_element_type=f32)       # (1, nR)
    row_id = jax.lax.broadcasted_iota(jnp.int32, (N, nR), 0)
    dag_mask = (ord_rows < ord_cols).astype(f32)                     # (N, nR) via broadcast
    mask = jnp.where(row_id < nR, dag_mask, 1.0)                     # bipartite rows unmasked

    # ---- RelaxedBernoulli(temperature=TEMP).rsample() with logistic noise; [G ; A] in one shot
    un = unif_ref[...]                                               # uniform (1e-6, 1-1e-6)
    noise = jnp.log(un) - jnp.log(1.0 - un)
    ga = mask / (1.0 + jnp.exp(-(logits + noise) / TEMP))            # (N, nR)

    # ---- graph aggregation: W = norm_graph([G;A]);  pz = W @ (trans_cond_y(yR) + qz_R params)
    w = ga / (jnp.sum(ga, axis=1, keepdims=True) + 1e-8)
    yR = y_ref[:nR, :]
    if dim_y == 1:
        cond = yR * tyw_ref[...] + tyb_ref[...]                      # VPU broadcast, no K=1 matmul
    else:
        cond = jnp.dot(yR, tyw_ref[...], preferred_element_type=f32) + tyb_ref[...]
    qzR = enc[:nR, 2 * dim_u:]                                       # (nR, 2*dim_z) [mean|logscale]
    pz = jnp.dot(w, cond + qzR, preferred_element_type=f32)          # (N, 2*dim_z), single wide dot
    pz_mean = pz[:, :dim_z]
    pz_logscale = pz[:, dim_z:]
    pqz = _normal_logprob(z, pz_mean, pz_logscale) - _normal_logprob(z, qz_mean, qz_logscale)

    # ---- output head: final_rep = [sR, z, u]; first Linear split by row blocks (no concat/tile)
    sR = jnp.mean(x[:nR, :], axis=0, keepdims=True)                  # (1, dim_x)
    o1w = o1w_ref[...]
    h2 = (jnp.dot(sR, o1w[:dim_x, :], preferred_element_type=f32)
          + jnp.dot(z, o1w[dim_x:dim_x + dim_z, :], preferred_element_type=f32)
          + jnp.dot(u, o1w[dim_x + dim_z:, :], preferred_element_type=f32)
          + o1b_ref[...])
    h2 = jnp.maximum(h2, 0.0)
    o = jnp.dot(h2, o2w_ref[...], preferred_element_type=f32) + o2b_ref[...]
    mean_y = o[:, :dim_y]
    raw = o[:, dim_y:]
    sp = jnp.where(raw > 0.0,
                   raw + jnp.log(1.0 + jnp.exp(-raw)),
                   jnp.log(1.0 + jnp.exp(raw)))                      # softplus
    logstd_y = jnp.log(0.1 + 0.9 * sp)

    # packed [mean_y | logstd_y] output (single HBM slab, split in the wrapper)
    ypack_ref[:, :dim_y] = mean_y
    ypack_ref[:, dim_y:] = logstd_y

    # ---- objective (fb_z == 0, use_ref_labels=True); reductions stay in-kernel
    log_py = _normal_logprob(y_ref[...], mean_y, logstd_y)
    log_pqz_R = _sum11(pqz[:nR, :])
    log_pqz_M = _sum11(pqz[nR:, :])
    log_py_R = _sum11(log_py[:nR, :])
    log_py_M = _sum11(log_py[nR:, :])
    obj = (log_py_R + log_pqz_R) / float(num_M) + (log_py_M + log_pqz_M) / float(nM)
    loss_ref[...] = -obj


# ----------------------------------------------------------------------------
# Parameter init (deterministic, PyTorch-Linear-style uniform)
# ----------------------------------------------------------------------------
def init_params(key, dim_x, dim_y, dim_h, dim_u, dim_z):
    def linear(k, fan_in, fan_out):
        k1, k2 = jax.random.split(k)
        bound = 1.0 / math.sqrt(fan_in)
        w = jax.random.uniform(k1, (fan_in, fan_out), jnp.float32, -bound, bound)
        b = jax.random.uniform(k2, (1, fan_out), jnp.float32, -bound, bound)
        return w, b

    keys = jax.random.split(key, 5)
    p = {}
    p['cond_w'], p['cond_b'] = linear(keys[0], dim_x, dim_h)                      # cond_trans
    # fused p_u + q_z head: columns = [pu_mean | pu_logscale | qz_mean | qz_logscale]
    p['enc_w'], p['enc_b'] = linear(keys[1], dim_h, 2 * dim_u + 2 * dim_z)
    p['ty_w'], p['ty_b'] = linear(keys[2], dim_y, 2 * dim_z)                      # trans_cond_y
    d_in = dim_x + dim_z + dim_u                                                  # use_plus=True, [sR,z,u]
    p['out1_w'], p['out1_b'] = linear(keys[3], d_in, dim_h)                       # output[0]
    p['out2_w'], p['out2_b'] = linear(keys[4], dim_h, 2 * dim_y)                  # output[2]
    p['pairwise_g_logscale'] = jnp.full((1, 1), math.log(math.sqrt(dim_u)), jnp.float32)
    return p


# ----------------------------------------------------------------------------
# Forward pass (matches RegressionFNP2.forward with default flags)
# ----------------------------------------------------------------------------
def regression_fnp2_forward(params, XR, yR, XM, yM, key, num_M):
    nR, nM = XR.shape[0], XM.shape[0]
    N = nR + nM
    dim_x = XR.shape[1]
    dim_y = yR.shape[1]
    dim_z = params['ty_w'].shape[1] // 2
    dim_u = (params['enc_w'].shape[1] - 2 * dim_z) // 2

    X_all = jnp.concatenate([XR, XM], axis=0)
    y_all = jnp.concatenate([yR, yM], axis=0)

    # TODO(synk): torch RNG streams (Normal.rsample / RelaxedBernoulli) cannot be matched;
    # distribution-equivalent noise is generated here and consumed inside the fused kernel.
    k_eps, k_un = jax.random.split(key, 2)
    eps = jax.random.normal(k_eps, (N, dim_u + dim_z), jnp.float32)
    unif = jax.random.uniform(k_un, (N, nR), jnp.float32, 1e-6, 1.0 - 1e-6)

    pg_scale = jnp.exp(params['pairwise_g_logscale']).astype(jnp.float32)   # (1,1) SMEM scalar

    kernel = functools.partial(_fnp2_fused_kernel, nR, nM, dim_x, dim_y, dim_u, dim_z, num_M)
    ypack, loss11 = pl.pallas_call(
        kernel,
        out_shape=(jax.ShapeDtypeStruct((N, 2 * dim_y), jnp.float32),
                   jax.ShapeDtypeStruct((1, 1), jnp.float32)),
        in_specs=[_SMEM] + [_VMEM] * 14,
        out_specs=(_VMEM, _VMEM),
    )(pg_scale, X_all, y_all, eps, unif,
      params['cond_w'], params['cond_b'], params['enc_w'], params['enc_b'],
      params['ty_w'], params['ty_b'],
      params['out1_w'], params['out1_b'], params['out2_w'], params['out2_b'])

    loss = loss11[0, 0]
    mean_y = ypack[:, :dim_y]
    logstd_y = ypack[:, dim_y:]
    return loss, mean_y, logstd_y


if __name__ == "__main__":
    dim_x, dim_y, dim_h, dim_u, dim_z = 4, 1, 32, 2, 2
    nR, nM = 8, 8

    params = init_params(jax.random.PRNGKey(42), dim_x, dim_y, dim_h, dim_u, dim_z)

    key = jax.random.PRNGKey(0)
    kx, ky, kxm, kym, kfwd = jax.random.split(key, 5)
    XR = jax.random.normal(kx, (nR, dim_x), jnp.float32)
    yR = jax.random.normal(ky, (nR, dim_y), jnp.float32)
    XM = jax.random.normal(kxm, (nM, dim_x), jnp.float32)
    yM = jax.random.normal(kym, (nM, dim_y), jnp.float32)

    fwd = jax.jit(regression_fnp2_forward, static_argnames=('num_M',))
    loss, mean_y, logstd_y = fwd(params, XR, yR, XM, yM, kfwd, num_M=nM)
    jax.block_until_ready((loss, mean_y, logstd_y))

    assert mean_y.shape == (nR + nM, dim_y) and logstd_y.shape == (nR + nM, dim_y)
    assert bool(jnp.isfinite(loss))
    print("KERNEL_OK")
</pallas_src>

<mosaic_0001>
module attributes {stable_mosaic.version = 11 : i64} {
  func.func @_fnp2_fused_kernel(%arg0: memref<1x1xf32, #tpu.memory_space<smem>>, %arg1: memref<16x4xf32, #tpu.memory_space<vmem>>, %arg2: memref<16x1xf32, #tpu.memory_space<vmem>>, %arg3: memref<16x4xf32, #tpu.memory_space<vmem>>, %arg4: memref<16x8xf32, #tpu.memory_space<vmem>>, %arg5: memref<4x32xf32, #tpu.memory_space<vmem>>, %arg6: memref<1x32xf32, #tpu.memory_space<vmem>>, %arg7: memref<32x8xf32, #tpu.memory_space<vmem>>, %arg8: memref<1x8xf32, #tpu.memory_space<vmem>>, %arg9: memref<1x4xf32, #tpu.memory_space<vmem>>, %arg10: memref<1x4xf32, #tpu.memory_space<vmem>>, %arg11: memref<8x32xf32, #tpu.memory_space<vmem>>, %arg12: memref<1x32xf32, #tpu.memory_space<vmem>>, %arg13: memref<32x2xf32, #tpu.memory_space<vmem>>, %arg14: memref<1x2xf32, #tpu.memory_space<vmem>>, %arg15: memref<16x2xf32, #tpu.memory_space<vmem>>, %arg16: memref<1x1xf32, #tpu.memory_space<vmem>>) attributes {dimension_semantics = [], scalar_prefetch = 0 : i64, scratch_operands = 0 : i64, tpu.core_type = #tpu.core_type<tc>} {
    %c0 = arith.constant 0 : index
    %c0_0 = arith.constant 0 : index
    %0 = vector.load %arg1[%c0, %c0_0] : memref<16x4xf32, #tpu.memory_space<vmem>>, vector<16x4xf32>
    %c0_1 = arith.constant 0 : index
    %c0_2 = arith.constant 0 : index
    %1 = vector.load %arg5[%c0_1, %c0_2] : memref<4x32xf32, #tpu.memory_space<vmem>>, vector<4x32xf32>
    %cst = arith.constant dense<0.000000e+00> : vector<16x32xf32>
    %2 = tpu.matmul %0, %1, %cst {dimension_numbers = #tpu.dot_dimension_numbers<[1], [0], [0], [1], [0, 0, 1, 1], [], []>} : vector<16x4xf32>, vector<4x32xf32>, vector<16x32xf32> -> vector<16x32xf32>
    %c0_3 = arith.constant 0 : index
    %c0_4 = arith.constant 0 : index
    %3 = vector.load %arg6[%c0_3, %c0_4] : memref<1x32xf32, #tpu.memory_space<vmem>>, vector<1x32xf32>
    %4 = vector.broadcast %3 : vector<1x32xf32> to vector<16x32xf32>
    %5 = arith.addf %2, %4 : vector<16x32xf32>
    %cst_5 = arith.constant 0.000000e+00 : f32
    %6 = vector.broadcast %cst_5 : f32 to vector<16x32xf32>
    %7 = arith.maximumf %5, %6 : vector<16x32xf32>
    %c0_6 = arith.constant 0 : index
    %c0_7 = arith.constant 0 : index
    %8 = vector.load %arg7[%c0_6, %c0_7] : memref<32x8xf32, #tpu.memory_space<vmem>>, vector<32x8xf32>
    %cst_8 = arith.constant dense<0.000000e+00> : vector<16x8xf32>
    %9 = tpu.matmul %7, %8, %cst_8 {dimension_numbers = #tpu.dot_dimension_numbers<[1], [0], [0], [1], [0, 0, 1, 1], [], []>} : vector<16x32xf32>, vector<32x8xf32>, vector<16x8xf32> -> vector<16x8xf32>
    %c0_9 = arith.constant 0 : index
    %c0_10 = arith.constant 0 : index
    %10 = vector.load %arg8[%c0_9, %c0_10] : memref<1x8xf32, #tpu.memory_space<vmem>>, vector<1x8xf32>
    %11 = vector.broadcast %10 : vector<1x8xf32> to vector<16x8xf32>
    %12 = arith.addf %9, %11 : vector<16x8xf32>
    %13 = vector.extract_strided_slice %12 {offsets = [0, 0], sizes = [16, 2], strides = [1, 1]} : vector<16x8xf32> to vector<16x2xf32>
    %14 = vector.extract_strided_slice %12 {offsets = [0, 2], sizes = [16, 2], strides = [1, 1]} : vector<16x8xf32> to vector<16x2xf32>
    %15 = vector.extract_strided_slice %12 {offsets = [0, 4], sizes = [16, 2], strides = [1, 1]} : vector<16x8xf32> to vector<16x2xf32>
    %16 = vector.extract_strided_slice %12 {offsets = [0, 6], sizes = [16, 2], strides = [1, 1]} : vector<16x8xf32> to vector<16x2xf32>
    %c0_11 = arith.constant 0 : index
    %c0_12 = arith.constant 0 : index
    %17 = vector.load %arg3[%c0_11, %c0_12] : memref<16x4xf32, #tpu.memory_space<vmem>>, vector<16x4xf32>
    %18 = math.exp %14 : vector<16x2xf32>
    %19 = vector.extract_strided_slice %17 {offsets = [0, 0], sizes = [16, 2], strides = [1, 1]} : vector<16x4xf32> to vector<16x2xf32>
    %20 = arith.mulf %18, %19 : vector<16x2xf32>
    %21 = arith.addf %13, %20 : vector<16x2xf32>
    %22 = math.exp %16 : vector<16x2xf32>
    %23 = vector.extract_strided_slice %17 {offsets = [0, 2], sizes = [16, 2], strides = [1, 1]} : vector<16x4xf32> to vector<16x2xf32>
    %24 = arith.mulf %22, %23 : vector<16x2xf32>
    %25 = arith.addf %15, %24 : vector<16x2xf32>
    %26 = vector.extract_strided_slice %21 {offsets = [0, 0], sizes = [8, 2], strides = [1, 1]} : vector<16x2xf32> to vector<8x2xf32>
    %cst_13 = arith.constant dense<0.000000e+00> : vector<16x8xf32>
    %27 = tpu.matmul %21, %26, %cst_13 {dimension_numbers = #tpu.dot_dimension_numbers<[1], [1], [0], [0], [0, 0, 1, 0], [], []>} : vector<16x2xf32>, vector<8x2xf32>, vector<16x8xf32> -> vector<16x8xf32>
    %28 = arith.mulf %21, %21 : vector<16x2xf32>
    %cst_14 = arith.constant dense<0.000000e+00> : vector<16xf32>
    %29 = vector.multi_reduction <add>, %28, %cst_14 [1] : vector<16x2xf32> to vector<16xf32>
    %30 = vector.shape_cast %29 : vector<16xf32> to vector<16x1xf32>
    %cst_15 = arith.constant 1.000000e+00 : f32
    %31 = vector.broadcast %cst_15 : f32 to vector<1x2xf32>
    %32 = arith.mulf %26, %26 : vector<8x2xf32>
    %cst_16 = arith.constant dense<0.000000e+00> : vector<1x8xf32>
    %33 = tpu.matmul %31, %32, %cst_16 {dimension_numbers = #tpu.dot_dimension_numbers<[1], [1], [0], [0], [0, 0, 1, 0], [], []>} : vector<1x2xf32>, vector<8x2xf32>, vector<1x8xf32> -> vector<1x8xf32>
    %34 = vector.broadcast %30 : vector<16x1xf32> to vector<16x8xf32>
    %35 = vector.broadcast %33 : vector<1x8xf32> to vector<16x8xf32>
    %36 = arith.addf %34, %35 : vector<16x8xf32>
    %cst_17 = arith.constant 2.000000e+00 : f32
    %37 = vector.broadcast %cst_17 : f32 to vector<16x8xf32>
    %38 = arith.mulf %37, %27 : vector<16x8xf32>
    %39 = arith.subf %36, %38 : vector<16x8xf32>
    %cst_18 = arith.constant 0.000000e+00 : f32
    %40 = vector.broadcast %cst_18 : f32 to vector<16x8xf32>
    %41 = arith.maximumf %39, %40 : vector<16x8xf32>
    %cst_19 = arith.constant -5.000000e-01 : f32
    %42 = vector.broadcast %cst_19 : f32 to vector<16x8xf32>
    %43 = arith.mulf %42, %41 : vector<16x8xf32>
    %c0_20 = arith.constant 0 : index
    %c0_21 = arith.constant 0 : index
    %44 = memref.load %arg0[%c0_20, %c0_21] : memref<1x1xf32, #tpu.memory_space<smem>>
    %45 = vector.broadcast %44 : f32 to vector<16x8xf32>
    %46 = arith.divf %43, %45 : vector<16x8xf32>
    %cst_22 = arith.constant -0.693147182 : f32
    %47 = vector.broadcast %cst_22 : f32 to vector<16x8xf32>
    %48 = arith.maximumf %46, %47 : vector<16x8xf32>
    %cst_23 = arith.constant -0.693147182 : f32
    %49 = vector.broadcast %cst_23 : f32 to vector<16x8xf32>
    %50 = arith.minimumf %46, %49 : vector<16x8xf32>
    %51 = math.exp %50 : vector<16x8xf32>
    %cst_24 = arith.constant 1.000000e+00 : f32
    %52 = vector.broadcast %cst_24 : f32 to vector<16x8xf32>
    %53 = arith.subf %52, %51 : vector<16x8xf32>
    %54 = math.log %53 : vector<16x8xf32>
    %55 = arith.subf %50, %54 : vector<16x8xf32>
    %cst_25 = arith.constant 0.000000e+00 : f32
    %56 = vector.broadcast %cst_25 : f32 to vector<16x8xf32>
    %57 = arith.subf %56, %48 : vector<16x8xf32>
    %58 = math.exp %57 : vector<16x8xf32>
    %cst_26 = arith.constant 1.000000e+00 : f32
    %59 = vector.broadcast %cst_26 : f32 to vector<16x8xf32>
    %60 = arith.subf %58, %59 : vector<16x8xf32>
    %cst_27 = arith.constant 9.99999968E-21 : f32
    %61 = vector.broadcast %cst_27 : f32 to vector<16x8xf32>
    %62 = arith.maximumf %60, %61 : vector<16x8xf32>
    %63 = math.log %62 : vector<16x8xf32>
    %cst_28 = arith.constant 0.000000e+00 : f32
    %64 = vector.broadcast %cst_28 : f32 to vector<16x8xf32>
    %65 = arith.subf %64, %63 : vector<16x8xf32>
    %cst_29 = arith.constant -0.693147182 : f32
    %66 = vector.broadcast %cst_29 : f32 to vector<16x8xf32>
    %67 = arith.cmpf ogt, %46, %66 : vector<16x8xf32>
    %68 = arith.select %67, %65, %55 : vector<16x8xi1>, vector<16x8xf32>
    %cst_30 = arith.constant 0.707106769 : f32
    %69 = vector.broadcast %cst_30 : f32 to vector<16x2xf32>
    %70 = arith.mulf %21, %69 : vector<16x2xf32>
    %71 = math.absf %70 : vector<16x2xf32>
    %cst_31 = arith.constant 0.327591091 : f32
    %72 = vector.broadcast %cst_31 : f32 to vector<16x2xf32>
    %73 = arith.mulf %72, %71 : vector<16x2xf32>
    %cst_32 = arith.constant 1.000000e+00 : f32
    %74 = vector.broadcast %cst_32 : f32 to vector<16x2xf32>
    %75 = arith.addf %74, %73 : vector<16x2xf32>
    %cst_33 = arith.constant 1.000000e+00 : f32
    %76 = vector.broadcast %cst_33 : f32 to vector<16x2xf32>
    %77 = arith.divf %76, %75 : vector<16x2xf32>
    %cst_34 = arith.constant 1.06140542 : f32
    %78 = vector.broadcast %cst_34 : f32 to vector<16x2xf32>
    %79 = arith.mulf %78, %77 : vector<16x2xf32>
    %cst_35 = arith.constant -1.45315206 : f32
    %80 = vector.broadcast %cst_35 : f32 to vector<16x2xf32>
    %81 = arith.addf %79, %80 : vector<16x2xf32>
    %82 = arith.mulf %81, %77 : vector<16x2xf32>
    %cst_36 = arith.constant 1.42141378 : f32
    %83 = vector.broadcast %cst_36 : f32 to vector<16x2xf32>
    %84 = arith.addf %82, %83 : vector<16x2xf32>
    %85 = arith.mulf %84, %77 : vector<16x2xf32>
    %cst_37 = arith.constant -0.284496725 : f32
    %86 = vector.broadcast %cst_37 : f32 to vector<16x2xf32>
    %87 = arith.addf %85, %86 : vector<16x2xf32>
    %88 = arith.mulf %87, %77 : vector<16x2xf32>
    %cst_38 = arith.constant 0.254829586 : f32
    %89 = vector.broadcast %cst_38 : f32 to vector<16x2xf32>
    %90 = arith.addf %88, %89 : vector<16x2xf32>
    %91 = arith.mulf %90, %77 : vector<16x2xf32>
    %cst_39 = arith.constant 0.000000e+00 : f32
    %92 = vector.broadcast %cst_39 : f32 to vector<16x2xf32>
    %93 = arith.subf %92, %71 : vector<16x2xf32>
    %94 = arith.mulf %93, %71 : vector<16x2xf32>
    %95 = math.exp %94 : vector<16x2xf32>
    %96 = arith.mulf %91, %95 : vector<16x2xf32>
    %cst_40 = arith.constant 1.000000e+00 : f32
    %97 = vector.broadcast %cst_40 : f32 to vector<16x2xf32>
    %98 = arith.subf %97, %96 : vector<16x2xf32>
    %cst_41 = arith.constant 0.000000e+00 : f32
    %99 = vector.broadcast %cst_41 : f32 to vector<16x2xf32>
    %100 = arith.cmpf oge, %70, %99 : vector<16x2xf32>
    %cst_42 = arith.constant 0.000000e+00 : f32
    %101 = vector.broadcast %cst_42 : f32 to vector<16x2xf32>
    %102 = arith.subf %101, %98 : vector<16x2xf32>
    %103 = arith.select %100, %98, %102 : vector<16x2xi1>, vector<16x2xf32>
    %cst_43 = arith.constant 1.000000e+00 : f32
    %104 = vector.broadcast %cst_43 : f32 to vector<16x2xf32>
    %105 = arith.addf %104, %103 : vector<16x2xf32>
    %cst_44 = arith.constant 5.000000e-01 : f32
    %106 = vector.broadcast %cst_44 : f32 to vector<16x2xf32>
    %107 = arith.mulf %106, %105 : vector<16x2xf32>
    %cst_45 = arith.constant 9.99999996E-13 : f32
    %108 = vector.broadcast %cst_45 : f32 to vector<16x2xf32>
    %109 = arith.maximumf %107, %108 : vector<16x2xf32>
    %110 = math.log %109 : vector<16x2xf32>
    %cst_46 = arith.constant dense<0.000000e+00> : vector<16xf32>
    %111 = vector.multi_reduction <add>, %110, %cst_46 [1] : vector<16x2xf32> to vector<16xf32>
    %112 = vector.shape_cast %111 : vector<16xf32> to vector<16x1xf32>
    %cst_47 = arith.constant 1.000000e+00 : f32
    %113 = vector.broadcast %cst_47 : f32 to vector<1x2xf32>
    %114 = vector.extract_strided_slice %110 {offsets = [0, 0], sizes = [8, 2], strides = [1, 1]} : vector<16x2xf32> to vector<8x2xf32>
    %cst_48 = arith.constant dense<0.000000e+00> : vector<1x8xf32>
    %115 = tpu.matmul %113, %114, %cst_48 {dimension_numbers = #tpu.dot_dimension_numbers<[1], [1], [0], [0], [0, 0, 1, 0], [], []>} : vector<1x2xf32>, vector<8x2xf32>, vector<1x8xf32> -> vector<1x8xf32>
    %116 = tpu.iota {dimensions = array<i32: 0>} : vector<16x8xi32>
    %117 = vector.broadcast %112 : vector<16x1xf32> to vector<16x8xf32>
    %118 = vector.broadcast %115 : vector<1x8xf32> to vector<16x8xf32>
    %119 = arith.cmpf olt, %117, %118 : vector<16x8xf32>
    %120 = arith.extui %119 : vector<16x8xi1> to vector<16x8xi32>
    %121 = arith.sitofp %120 : vector<16x8xi32> to vector<16x8xf32>
    %c8_i32 = arith.constant 8 : i32
    %122 = vector.broadcast %c8_i32 : i32 to vector<16x8xi32>
    %123 = arith.cmpi slt, %116, %122 : vector<16x8xi32>
    %cst_49 = arith.constant 1.000000e+00 : f32
    %124 = vector.broadcast %cst_49 : f32 to vector<16x8xf32>
    %125 = arith.select %123, %121, %124 : vector<16x8xi1>, vector<16x8xf32>
    %c0_50 = arith.constant 0 : index
    %c0_51 = arith.constant 0 : index
    %126 = vector.load %arg4[%c0_50, %c0_51] : memref<16x8xf32, #tpu.memory_space<vmem>>, vector<16x8xf32>
    %127 = math.log %126 : vector<16x8xf32>
    %cst_52 = arith.constant 1.000000e+00 : f32
    %128 = vector.broadcast %cst_52 : f32 to vector<16x8xf32>
    %129 = arith.subf %128, %126 : vector<16x8xf32>
    %130 = math.log %129 : vector<16x8xf32>
    %131 = arith.subf %127, %130 : vector<16x8xf32>
    %132 = arith.addf %68, %131 : vector<16x8xf32>
    %cst_53 = arith.constant 0.000000e+00 : f32
    %133 = vector.broadcast %cst_53 : f32 to vector<16x8xf32>
    %134 = arith.subf %133, %132 : vector<16x8xf32>
    %cst_54 = arith.constant 3.000000e-01 : f32
    %135 = vector.broadcast %cst_54 : f32 to vector<16x8xf32>
    %136 = arith.divf %134, %135 : vector<16x8xf32>
    %137 = math.exp %136 : vector<16x8xf32>
    %cst_55 = arith.constant 1.000000e+00 : f32
    %138 = vector.broadcast %cst_55 : f32 to vector<16x8xf32>
    %139 = arith.addf %138, %137 : vector<16x8xf32>
    %140 = arith.divf %125, %139 : vector<16x8xf32>
    %cst_56 = arith.constant dense<0.000000e+00> : vector<16xf32>
    %141 = vector.multi_reduction <add>, %140, %cst_56 [1] : vector<16x8xf32> to vector<16xf32>
    %142 = vector.shape_cast %141 : vector<16xf32> to vector<16x1xf32>
    %cst_57 = arith.constant 9.99999993E-9 : f32
    %143 = vector.broadcast %cst_57 : f32 to vector<16x1xf32>
    %144 = arith.addf %142, %143 : vector<16x1xf32>
    %145 = vector.broadcast %144 : vector<16x1xf32> to vector<16x8xf32>
    %146 = arith.divf %140, %145 : vector<16x8xf32>
    %c0_58 = arith.constant 0 : index
    %c0_59 = arith.constant 0 : index
    %147 = vector.load %arg2[%c0_58, %c0_59] : memref<16x1xf32, #tpu.memory_space<vmem>>, vector<8x1xf32>
    %c0_60 = arith.constant 0 : index
    %c0_61 = arith.constant 0 : index
    %148 = vector.load %arg9[%c0_60, %c0_61] : memref<1x4xf32, #tpu.memory_space<vmem>>, vector<1x4xf32>
    %149 = vector.broadcast %147 : vector<8x1xf32> to vector<8x4xf32>
    %150 = vector.broadcast %148 : vector<1x4xf32> to vector<8x4xf32>
    %151 = arith.mulf %149, %150 : vector<8x4xf32>
    %c0_62 = arith.constant 0 : index
    %c0_63 = arith.constant 0 : index
    %152 = vector.load %arg10[%c0_62, %c0_63] : memref<1x4xf32, #tpu.memory_space<vmem>>, vector<1x4xf32>
    %153 = vector.broadcast %152 : vector<1x4xf32> to vector<8x4xf32>
    %154 = arith.addf %151, %153 : vector<8x4xf32>
    %155 = vector.extract_strided_slice %12 {offsets = [0, 4], sizes = [8, 4], strides = [1, 1]} : vector<16x8xf32> to vector<8x4xf32>
    %156 = arith.addf %154, %155 : vector<8x4xf32>
    %cst_64 = arith.constant dense<0.000000e+00> : vector<16x4xf32>
    %157 = tpu.matmul %146, %156, %cst_64 {dimension_numbers = #tpu.dot_dimension_numbers<[1], [0], [0], [1], [0, 0, 1, 1], [], []>} : vector<16x8xf32>, vector<8x4xf32>, vector<16x4xf32> -> vector<16x4xf32>
    %158 = vector.extract_strided_slice %157 {offsets = [0, 0], sizes = [16, 2], strides = [1, 1]} : vector<16x4xf32> to vector<16x2xf32>
    %159 = vector.extract_strided_slice %157 {offsets = [0, 2], sizes = [16, 2], strides = [1, 1]} : vector<16x4xf32> to vector<16x2xf32>
    %cst_65 = arith.constant 0.000000e+00 : f32
    %160 = vector.broadcast %cst_65 : f32 to vector<16x2xf32>
    %161 = arith.subf %160, %159 : vector<16x2xf32>
    %cst_66 = arith.constant 0.918938517 : f32
    %162 = vector.broadcast %cst_66 : f32 to vector<16x2xf32>
    %163 = arith.subf %161, %162 : vector<16x2xf32>
    %164 = arith.subf %25, %158 : vector<16x2xf32>
    %cst_67 = arith.constant 5.000000e-01 : f32
    %165 = vector.broadcast %cst_67 : f32 to vector<16x2xf32>
    %166 = arith.mulf %165, %164 : vector<16x2xf32>
    %167 = arith.subf %25, %158 : vector<16x2xf32>
    %168 = arith.mulf %166, %167 : vector<16x2xf32>
    %cst_68 = arith.constant -2.000000e+00 : f32
    %169 = vector.broadcast %cst_68 : f32 to vector<16x2xf32>
    %170 = arith.mulf %169, %159 : vector<16x2xf32>
    %171 = math.exp %170 : vector<16x2xf32>
    %172 = arith.mulf %168, %171 : vector<16x2xf32>
    %173 = arith.subf %163, %172 : vector<16x2xf32>
    %cst_69 = arith.constant 0.000000e+00 : f32
    %174 = vector.broadcast %cst_69 : f32 to vector<16x2xf32>
    %175 = arith.subf %174, %16 : vector<16x2xf32>
    %cst_70 = arith.constant 0.918938517 : f32
    %176 = vector.broadcast %cst_70 : f32 to vector<16x2xf32>
    %177 = arith.subf %175, %176 : vector<16x2xf32>
    %178 = arith.subf %25, %15 : vector<16x2xf32>
    %cst_71 = arith.constant 5.000000e-01 : f32
    %179 = vector.broadcast %cst_71 : f32 to vector<16x2xf32>
    %180 = arith.mulf %179, %178 : vector<16x2xf32>
    %181 = arith.subf %25, %15 : vector<16x2xf32>
    %182 = arith.mulf %180, %181 : vector<16x2xf32>
    %cst_72 = arith.constant -2.000000e+00 : f32
    %183 = vector.broadcast %cst_72 : f32 to vector<16x2xf32>
    %184 = arith.mulf %183, %16 : vector<16x2xf32>
    %185 = math.exp %184 : vector<16x2xf32>
    %186 = arith.mulf %182, %185 : vector<16x2xf32>
    %187 = arith.subf %177, %186 : vector<16x2xf32>
    %188 = arith.subf %173, %187 : vector<16x2xf32>
    %189 = vector.extract_strided_slice %0 {offsets = [0, 0], sizes = [8, 4], strides = [1, 1]} : vector<16x4xf32> to vector<8x4xf32>
    %cst_73 = arith.constant dense<0.000000e+00> : vector<4xf32>
    %190 = vector.multi_reduction <add>, %189, %cst_73 [0] : vector<8x4xf32> to vector<4xf32>
    %191 = vector.shape_cast %190 : vector<4xf32> to vector<1x4xf32>
    %cst_74 = arith.constant 8.000000e+00 : f32
    %192 = vector.broadcast %cst_74 : f32 to vector<1x4xf32>
    %193 = arith.divf %191, %192 : vector<1x4xf32>
    %c0_75 = arith.constant 0 : index
    %c0_76 = arith.constant 0 : index
    %194 = vector.load %arg11[%c0_75, %c0_76] : memref<8x32xf32, #tpu.memory_space<vmem>>, vector<8x32xf32>
    %195 = vector.extract_strided_slice %194 {offsets = [0, 0], sizes = [4, 32], strides = [1, 1]} : vector<8x32xf32> to vector<4x32xf32>
    %cst_77 = arith.constant dense<0.000000e+00> : vector<1x32xf32>
    %196 = tpu.matmul %193, %195, %cst_77 {dimension_numbers = #tpu.dot_dimension_numbers<[1], [0], [0], [1], [0, 0, 1, 1], [], []>} : vector<1x4xf32>, vector<4x32xf32>, vector<1x32xf32> -> vector<1x32xf32>
    %197 = vector.extract_strided_slice %194 {offsets = [4, 0], sizes = [2, 32], strides = [1, 1]} : vector<8x32xf32> to vector<2x32xf32>
    %cst_78 = arith.constant dense<0.000000e+00> : vector<16x32xf32>
    %198 = tpu.matmul %25, %197, %cst_78 {dimension_numbers = #tpu.dot_dimension_numbers<[1], [0], [0], [1], [0, 0, 1, 1], [], []>} : vector<16x2xf32>, vector<2x32xf32>, vector<16x32xf32> -> vector<16x32xf32>
    %199 = vector.broadcast %196 : vector<1x32xf32> to vector<16x32xf32>
    %200 = arith.addf %199, %198 : vector<16x32xf32>
    %201 = vector.extract_strided_slice %194 {offsets = [6, 0], sizes = [2, 32], strides = [1, 1]} : vector<8x32xf32> to vector<2x32xf32>
    %cst_79 = arith.constant dense<0.000000e+00> : vector<16x32xf32>
    %202 = tpu.matmul %21, %201, %cst_79 {dimension_numbers = #tpu.dot_dimension_numbers<[1], [0], [0], [1], [0, 0, 1, 1], [], []>} : vector<16x2xf32>, vector<2x32xf32>, vector<16x32xf32> -> vector<16x32xf32>
    %203 = arith.addf %200, %202 : vector<16x32xf32>
    %c0_80 = arith.constant 0 : index
    %c0_81 = arith.constant 0 : index
    %204 = vector.load %arg12[%c0_80, %c0_81] : memref<1x32xf32, #tpu.memory_space<vmem>>, vector<1x32xf32>
    %205 = vector.broadcast %204 : vector<1x32xf32> to vector<16x32xf32>
    %206 = arith.addf %203, %205 : vector<16x32xf32>
    %cst_82 = arith.constant 0.000000e+00 : f32
    %207 = vector.broadcast %cst_82 : f32 to vector<16x32xf32>
    %208 = arith.maximumf %206, %207 : vector<16x32xf32>
    %c0_83 = arith.constant 0 : index
    %c0_84 = arith.constant 0 : index
    %209 = vector.load %arg13[%c0_83, %c0_84] : memref<32x2xf32, #tpu.memory_space<vmem>>, vector<32x2xf32>
    %cst_85 = arith.constant dense<0.000000e+00> : vector<16x2xf32>
    %210 = tpu.matmul %208, %209, %cst_85 {dimension_numbers = #tpu.dot_dimension_numbers<[1], [0], [0], [1], [0, 0, 1, 1], [], []>} : vector<16x32xf32>, vector<32x2xf32>, vector<16x2xf32> -> vector<16x2xf32>
    %c0_86 = arith.constant 0 : index
    %c0_87 = arith.constant 0 : index
    %211 = vector.load %arg14[%c0_86, %c0_87] : memref<1x2xf32, #tpu.memory_space<vmem>>, vector<1x2xf32>
    %212 = vector.broadcast %211 : vector<1x2xf32> to vector<16x2xf32>
    %213 = arith.addf %210, %212 : vector<16x2xf32>
    %214 = vector.extract_strided_slice %213 {offsets = [0, 0], sizes = [16, 1], strides = [1, 1]} : vector<16x2xf32> to vector<16x1xf32>
    %215 = vector.extract_strided_slice %213 {offsets = [0, 1], sizes = [16, 1], strides = [1, 1]} : vector<16x2xf32> to vector<16x1xf32>
    %cst_88 = arith.constant 0.000000e+00 : f32
    %216 = vector.broadcast %cst_88 : f32 to vector<16x1xf32>
    %217 = arith.cmpf ogt, %215, %216 : vector<16x1xf32>
    %cst_89 = arith.constant 0.000000e+00 : f32
    %218 = vector.broadcast %cst_89 : f32 to vector<16x1xf32>
    %219 = arith.subf %218, %215 : vector<16x1xf32>
    %220 = math.exp %219 : vector<16x1xf32>
    %cst_90 = arith.constant 1.000000e+00 : f32
    %221 = vector.broadcast %cst_90 : f32 to vector<16x1xf32>
    %222 = arith.addf %221, %220 : vector<16x1xf32>
    %223 = math.log %222 : vector<16x1xf32>
    %224 = arith.addf %215, %223 : vector<16x1xf32>
    %225 = math.exp %215 : vector<16x1xf32>
    %cst_91 = arith.constant 1.000000e+00 : f32
    %226 = vector.broadcast %cst_91 : f32 to vector<16x1xf32>
    %227 = arith.addf %226, %225 : vector<16x1xf32>
    %228 = math.log %227 : vector<16x1xf32>
    %229 = arith.select %217, %224, %228 : vector<16x1xi1>, vector<16x1xf32>
    %cst_92 = arith.constant 0.899999976 : f32
    %230 = vector.broadcast %cst_92 : f32 to vector<16x1xf32>
    %231 = arith.mulf %230, %229 : vector<16x1xf32>
    %cst_93 = arith.constant 1.000000e-01 : f32
    %232 = vector.broadcast %cst_93 : f32 to vector<16x1xf32>
    %233 = arith.addf %232, %231 : vector<16x1xf32>
    %234 = math.log %233 : vector<16x1xf32>
    %c0_94 = arith.constant 0 : index
    %c0_95 = arith.constant 0 : index
    %235 = vector.load %arg15[%c0_94, %c0_95] : memref<16x2xf32, #tpu.memory_space<vmem>>, vector<16x1xf32>
    tpu.vector_store %arg15[%c0_94, %c0_95], %214 {strides = array<i32>} : memref<16x2xf32, #tpu.memory_space<vmem>>, vector<16x1xf32>,
    %c0_96 = arith.constant 0 : index
    %c1 = arith.constant 1 : index
    %236 = vector.load %arg15[%c0_96, %c1] : memref<16x2xf32, #tpu.memory_space<vmem>>, vector<16x1xf32>
    tpu.vector_store %arg15[%c0_96, %c1], %234 {strides = array<i32>} : memref<16x2xf32, #tpu.memory_space<vmem>>, vector<16x1xf32>,
    %c0_97 = arith.constant 0 : index
    %c0_98 = arith.constant 0 : index
    %237 = vector.load %arg2[%c0_97, %c0_98] : memref<16x1xf32, #tpu.memory_space<vmem>>, vector<16x1xf32>
    %cst_99 = arith.constant 0.000000e+00 : f32
    %238 = vector.broadcast %cst_99 : f32 to vector<16x1xf32>
    %239 = arith.subf %238, %234 : vector<16x1xf32>
    %cst_100 = arith.constant 0.918938517 : f32
    %240 = vector.broadcast %cst_100 : f32 to vector<16x1xf32>
    %241 = arith.subf %239, %240 : vector<16x1xf32>
    %242 = arith.subf %237, %214 : vector<16x1xf32>
    %cst_101 = arith.constant 5.000000e-01 : f32
    %243 = vector.broadcast %cst_101 : f32 to vector<16x1xf32>
    %244 = arith.mulf %243, %242 : vector<16x1xf32>
    %245 = arith.subf %237, %214 : vector<16x1xf32>
    %246 = arith.mulf %244, %245 : vector<16x1xf32>
    %cst_102 = arith.constant -2.000000e+00 : f32
    %247 = vector.broadcast %cst_102 : f32 to vector<16x1xf32>
    %248 = arith.mulf %247, %234 : vector<16x1xf32>
    %249 = math.exp %248 : vector<16x1xf32>
    %250 = arith.mulf %246, %249 : vector<16x1xf32>
    %251 = arith.subf %241, %250 : vector<16x1xf32>
    %252 = vector.extract_strided_slice %188 {offsets = [0, 0], sizes = [8, 2], strides = [1, 1]} : vector<16x2xf32> to vector<8x2xf32>
    %cst_103 = arith.constant dense<0.000000e+00> : vector<8xf32>
    %253 = vector.multi_reduction <add>, %252, %cst_103 [1] : vector<8x2xf32> to vector<8xf32>
    %254 = vector.shape_cast %253 : vector<8xf32> to vector<8x1xf32>
    %cst_104 = arith.constant dense<0.000000e+00> : vector<1xf32>
    %255 = vector.multi_reduction <add>, %254, %cst_104 [0] : vector<8x1xf32> to vector<1xf32>
    %256 = vector.shape_cast %255 : vector<1xf32> to vector<1x1xf32>
    %257 = vector.extract_strided_slice %188 {offsets = [8, 0], sizes = [8, 2], strides = [1, 1]} : vector<16x2xf32> to vector<8x2xf32>
    %cst_105 = arith.constant dense<0.000000e+00> : vector<8xf32>
    %258 = vector.multi_reduction <add>, %257, %cst_105 [1] : vector<8x2xf32> to vector<8xf32>
    %259 = vector.shape_cast %258 : vector<8xf32> to vector<8x1xf32>
    %cst_106 = arith.constant dense<0.000000e+00> : vector<1xf32>
    %260 = vector.multi_reduction <add>, %259, %cst_106 [0] : vector<8x1xf32> to vector<1xf32>
    %261 = vector.shape_cast %260 : vector<1xf32> to vector<1x1xf32>
    %262 = vector.extract_strided_slice %251 {offsets = [0, 0], sizes = [8, 1], strides = [1, 1]} : vector<16x1xf32> to vector<8x1xf32>
    %cst_107 = arith.constant dense<0.000000e+00> : vector<8xf32>
    %263 = vector.multi_reduction <add>, %262, %cst_107 [1] : vector<8x1xf32> to vector<8xf32>
    %264 = vector.shape_cast %263 : vector<8xf32> to vector<8x1xf32>
    %cst_108 = arith.constant dense<0.000000e+00> : vector<1xf32>
    %265 = vector.multi_reduction <add>, %264, %cst_108 [0] : vector<8x1xf32> to vector<1xf32>
    %266 = vector.shape_cast %265 : vector<1xf32> to vector<1x1xf32>
    %267 = vector.extract_strided_slice %251 {offsets = [8, 0], sizes = [8, 1], strides = [1, 1]} : vector<16x1xf32> to vector<8x1xf32>
    %cst_109 = arith.constant dense<0.000000e+00> : vector<8xf32>
    %268 = vector.multi_reduction <add>, %267, %cst_109 [1] : vector<8x1xf32> to vector<8xf32>
    %269 = vector.shape_cast %268 : vector<8xf32> to vector<8x1xf32>
    %cst_110 = arith.constant dense<0.000000e+00> : vector<1xf32>
    %270 = vector.multi_reduction <add>, %269, %cst_110 [0] : vector<8x1xf32> to vector<1xf32>
    %271 = vector.shape_cast %270 : vector<1xf32> to vector<1x1xf32>
    %272 = arith.addf %266, %256 : vector<1x1xf32>
    %cst_111 = arith.constant 8.000000e+00 : f32
    %273 = vector.broadcast %cst_111 : f32 to vector<1x1xf32>
    %274 = arith.divf %272, %273 : vector<1x1xf32>
    %275 = arith.addf %271, %261 : vector<1x1xf32>
    %cst_112 = arith.constant 8.000000e+00 : f32
    %276 = vector.broadcast %cst_112 : f32 to vector<1x1xf32>
    %277 = arith.divf %275, %276 : vector<1x1xf32>
    %278 = arith.addf %274, %277 : vector<1x1xf32>
    %cst_113 = arith.constant 0.000000e+00 : f32
    %279 = vector.broadcast %cst_113 : f32 to vector<1x1xf32>
    %280 = arith.subf %279, %278 : vector<1x1xf32>
    %c0_114 = arith.constant 0 : index
    %c0_115 = arith.constant 0 : index
    %281 = vector.load %arg16[%c0_114, %c0_115] : memref<1x1xf32, #tpu.memory_space<vmem>>, vector<1x1xf32>
    tpu.vector_store %arg16[%c0_114, %c0_115], %280 {strides = array<i32>} : memref<1x1xf32, #tpu.memory_space<vmem>>, vector<1x1xf32>,
    return
  }
}

</mosaic_0001>

<bundles_post_ra>
// kernel: regression_fnp2_forward.3
= control target key start
LH: loop header
LB: loop body
LE: loop exit
PB: predicated region body
PF: predicated region fallthrough
CT: control target
= control target key end

     0   :  { %s2050_s0 = inlined_call_operand.<no memory space> [shape: f32[1,1], index: 0, kind: input, shape index: {}]   ;;  %s2051_s1 = inlined_call_operand.vmem [shape: f32[16,4], index: 1, kind: input, shape index: {}]   ;;  %s2052_s2 = inlined_call_operand.vmem [shape: f32[16,1], index: 2, kind: input, shape index: {}]   ;;  %s2053_s3 = inlined_call_operand.vmem [shape: f32[16,4], index: 3, kind: input, shape index: {}]   ;;  %s2054_s4 = inlined_call_operand.vmem [shape: f32[16,8], index: 4, kind: input, shape index: {}]   ;;  %s2055_s5 = inlined_call_operand.vmem [shape: f32[4,32], index: 5, kind: input, shape index: {}]   ;;  %s2056_s6 = inlined_call_operand.vmem [shape: f32[1,32], index: 6, kind: input, shape index: {}]   ;;  %s2057_s7 = inlined_call_operand.vmem [shape: f32[32,8], index: 7, kind: input, shape index: {}]   ;;  %s2058_s8 = inlined_call_operand.vmem [shape: f32[1,8], index: 8, kind: input, shape index: {}]   ;;  %s2059_s9 = inlined_call_operand.vmem [shape: f32[1,4], index: 9, kind: input, shape index: {}]   ;;  %s2060_s10 = inlined_call_operand.vmem [shape: f32[1,4], index: 10, kind: input, shape index: {}]   ;;  %s2061_s11 = inlined_call_operand.vmem [shape: f32[8,32], index: 11, kind: input, shape index: {}]   ;;  %s2062_s12 = inlined_call_operand.vmem [shape: f32[1,32], index: 12, kind: input, shape index: {}]   ;;  %s2063_s13 = inlined_call_operand.vmem [shape: f32[32,2], index: 13, kind: input, shape index: {}]   ;;  %s2064_s14 = inlined_call_operand.vmem [shape: f32[1,2], index: 14, kind: input, shape index: {}]   ;;  %s2065_s15 = inlined_call_operand.vmem [shape: f32[16,2], index: 15, kind: output, shape index: {0}]   ;;  %s2066_s16 = inlined_call_operand.hbm [shape: f32[1,1], index: 16, kind: output, shape index: {1}]  }
   0x1   :  { %2067 = sst [smem:[#allocation6_spill]] %s2050_s0 }
   0x2   :  { %v56_v0 = vld [vmem:[%s2055_s5] sm:$0xf]  ;;  %vm71_vm0 = vcmask 1043456   ;;  %vm64_vm1 = vcmask 31744   ;;  %v55_v2 = vld [vmem:[%s2051_s1 + $0x8] sm:$0xff] }
   0x3   :  { %v1773_v1 = vld [vmem:[%s2051_s1] sm:$0xff]  ;;  %1495 = vmatprep.subr.msk.mxu1 %vm71_vm0, %v56_v0 }
   0x4   :  { %1497 = vmatprep.mubr.msk.f32.mxu1 %vm64_vm1, %v1773_v1 }
   0x5   :  { %23 = vsyncpa [#allocation4], 0  ;;  %1496 = vmatpush3.msk.msra.mxu1 %vm71_vm0, %v56_v0  ;;  %v155_v3 = vld [vmem:[%s2057_s7 + $0x18] sm:$0xff]  ;;  %v154_v4 = vld [vmem:[%s2057_s7 + $0x10] sm:$0xff]  ;;  %s1671_s20 = smov 2   ;;  %vm163_vm2 = vcmask 261120  }
   0x6   :  { %1498 = vmatmul.mubr.msk.f32.vlgmr.msra.gmra.mxu1 %vm64_vm1, %v55_v2  ;;  %1500 = vmatprep.subr.mxu1 %v155_v3  ;;  %v153_v5 = vld [vmem:[%s2057_s7 + $0x8] sm:$0xff]  ;;  %v152_v6 = vld [vmem:[%s2057_s7] sm:$0xff]  ;;  %v1672_v24 = vmov 0.0   ;;  %vm1673_vm3 = vmmov 0   ;;  %vm289_vm4 = vcmask 15360   ;;  %v1675_v42 = vmov 1.0  }
   0x7   :  { %1501 = vmatpush3.msra.mxu1 %v155_v3  ;;  %v1798_v7 = vld [vmem:[%s2053_s3] sm:$0xff]  ;;  %v1805_v8 = vld [vmem:[%s2053_s3 + $0x8] sm:$0xff]  ;;  %v906_v60 = vsel %vm64_vm1, %v1773_v1, 0.0  ;;  %vm1003_vm6 = vcmask 1041408   ;;  %s2068_s28 = sld [smem:[#allocation6_spill]]  ;;  %vm695_vm10 = vcmask 64512  }
   0x8   :  { %1502 = vmatprep.subr.mxu1 %v154_v4  ;;  %253 = vrot.lane.b32.xlu0 %v1798_v7, %s1671_s20  ;;  %v1422_v9 = vld [vmem:[%s2056_s6] ss:$0 sm:$0xff]  ;;  %s1674_s6 = smov 126   ;;  %v907_v63 = vrot.slane %v906_v60, 4  ;;  %vm1306_vm11 = vcmask 7168   ;;  %vm1309_vm14 = vcmask 15368  }
   0x9   :  { %1503 = vmatpush3.msra.mxu1 %v154_v4  ;;  %v1426_v16 = vld [vmem:[%s2058_s8] ss:$0 sm:$0xff]  ;;  %s1676_s8 = smov 4   ;;  %vm1402_vm15 = vcmask 0  }
   0xa   :  { %1504 = vmatprep.subr.mxu1 %v153_v5  ;;  %v908_v3 = vadd.f32 %v907_v63, %v906_v60 }
   0xb   :  { %1505 = vmatpush3.msra.mxu1 %v153_v5 }
   0xc   :  { %1506 = vmatprep.subr.mxu1 %v152_v6  ;;  %255 = vrot.lane.b32.xlu0 %v1805_v8, %s1671_s20  ;;  %v909_v4 = vrot.slane %v908_v3, 2 }
   0xd   :  { %1507 = vmatpush3.msra.mxu1 %v152_v6 }
   0xe   :  { %1521 = vmatprep.subr.mxu1 %v1672_v24  ;;  %v910_v5 = vadd.f32 %v909_v4, %v908_v3 }
  0x10   :  { %v911_v6 = vrot.slane %v910_v5, 1 }
  0x7a   :  { %v254_v23 = vpop.permute.xlu0 %253 }
  0x7e   :  { %v256_v28 = vpop.permute.xlu0 %255 }
  0xc6   :  { %v1499_v10 = vpop.f32.mrf.mxu1 }
  0xc7   :  { %v147_v11 = vadd.f32 %v1499_v10, %v1422_v9  ;;  %v912_v10 = vadd.f32 %v911_v6, %v910_v5 }
  0xc8   :  { %v141_v12 = vpop.f32.mrf.mxu1 }
  0xc9   :  { %v142_v13 = vadd.f32 %v1422_v9, %v141_v12  ;;  %v151_v15 = vmax.f32 %v147_v11, 0.0  ;;  %v1869_v9 = vld [vmem:[%s2061_s11] sm:$0xff]  ;;  %v914_v12 = vmul.f32 0.125, %v912_v10  ;;  %s1677_s11 = smov 124  }
  0xca   :  { %v1087_v11 = vrot.slane %v1869_v9, 6 }
  0xcb   :  { %v150_v14 = vmax.f32 %v142_v13, 0.0 }
  0xcd   :  { %1508 = vmatprep.mubr.msk.f32.mxu1 %vm163_vm2, %v150_v14 }
  0xce   :  { %1509 = vmatmul.mubr.msk.f32.vlgmr.msra.gmra.mxu1 %vm163_vm2, %v151_v15 }
  0xcf   :  { %1523 = vmatprep.mubr.msk.f32.mxu1 %vm1673_vm3, %v1672_v24 }
 0x18e   :  { %v1510_v17 = vpop.f32.mrf.mxu1 }
 0x18f   :  { %v1817_v18 = vadd.f32 %v1510_v17, %v1426_v16 }
 0x190   :  { %v236_v19 = vpop.f32.mrf.mxu1 }
 0x191   :  { %v1819_v20 = vadd.f32 %v1426_v16, %v236_v19  ;;  %v249_v22 = vmul.f32 1.442695, %v1817_v18 }
 0x193   :  { %v247_v21 = vmul.f32 1.442695, %v1819_v20 }
 0x195   :  { %1569 = vpow2.f32 %v247_v21  ;;  %v1678_v21 = vmov 0  }
 0x196   :  { %1571 = vpow2.f32 %v249_v22  ;;  %1568 = vset.pattern.permute.xlu0 %v1678_v21  ;;  %v455_v22 = vlaneseq }
 0x1a2   :  { %v1826_v25 = vpop.eup %1569 }
 0x1a3   :  { %v259_v26 = vmul.f32 %v1826_v25, %v254_v23  ;;  %v1829_v27 = vpop.eup %1571  ;;  %v470_v23 = vstv %s2068_s28 }
 0x1a4   :  { %v260_v29 = vmul.f32 %v1829_v27, %v256_v28 }
 0x1a5   :  { %263 = vrot.lane.b32.xlu1 %v259_v26, %s1674_s6  ;;  %v456_v26 = vshrl.u32 %v455_v22, 7 }
 0x1a7   :  { %v1896_v28 = vsub.s32 0, %v456_v26 }
 0x1a9   :  { %265 = vrot.lane.b32.xlu1 %v260_v29, %s1674_s6 }
 0x217   :  { %v264_v30 = vpop.permute.xlu1 %263 }
 0x218   :  { %v1835_v31 = vadd.f32 %v264_v30, %v1819_v20 }
 0x21a   :  { %v510_v32 = vmul.f32 0.70710677, %v1835_v31  ;;  %1511 = vmatprep.subr.msk.mxu0 %vm289_vm4, %v1835_v31  ;;  %1513 = vmatprep.mubr.msk.f32.mxu0 %vm289_vm4, %v1835_v31  ;;  %v371_v33 = vmul.f32 %v1835_v31, %v1835_v31 }
 0x21b   :  { %1512 = vmatpush3.xpose.msk.msra.mxu0 %vm289_vm4, %v1835_v31  ;;  %v266_v34 = vpop.permute.xlu1 %265 }
 0x21c   :  { %v512_v35 = vand.u32 2147483647, %v510_v32  ;;  %v1847_v36 = vadd.f32 %v266_v34, %v1817_v18  ;;  %v373_v37 = vsel %vm289_vm4, %v371_v33, 0.0  ;;  %1516 = vmatprep.subr.mxu0 %v1672_v24  ;;  %vm552_vm5 = vcmp.ge.f32.partialorder %v510_v32, 0.0 }
 0x21d   :  { %374 = vadd.xlane.f32.xlu0 %v373_v37 }
 0x21e   :  { %v514_v38 = vmul.f32 0.3275911, %v512_v35  ;;  %1514 = vmatmul.mubr.msk.f32.vlgmr.msra.gmra.mxu0 %vm289_vm4, %v1847_v36  ;;  %v372_v39 = vmul.f32 %v1847_v36, %v1847_v36  ;;  %v540_v43 = vsub.f32 0.0, %v512_v35 }
 0x21f   :  { %1517 = vmatpush3.xpose.msk.msra.mxu0 %vm289_vm4, %v371_v33  ;;  %1518 = vmatprep.mubr.msk.f32.mxu0 %vm1673_vm3, %v1672_v24 }
 0x220   :  { %v516_v40 = vadd.f32 1.0, %v514_v38  ;;  %v376_v41 = vsel %vm289_vm4, %v372_v39, 0.0  ;;  %v542_v44 = vmul.f32 %v540_v43, %v512_v35 }
 0x221   :  { %377 = vadd.xlane.f32.xlu1 %v376_v41 }
 0x222   :  { %1573 = vrcp.f32 %v516_v40  ;;  %1519 = vmatmul.mubr.msk.f32.vlgmr.msra.gmra.mxu0 %vm289_vm4, %v1675_v42  ;;  %v544_v46 = vmul.f32 1.442695, %v542_v44 }
 0x224   :  { %1575 = vpow2.f32 %v544_v46 }
 0x22f   :  { %v1574_v45 = vpop.eup %1573 }
 0x230   :  { %v522_v47 = vmul.f32 1.0614054, %v1574_v45 }
 0x231   :  { %v1576_v56 = vpop.eup %1575 }
 0x232   :  { %273 = vrot.lane.b32.xlu1 %v1805_v8, %s1676_s8  ;;  %v524_v48 = vadd.f32 -1.4531521, %v522_v47 }
 0x233   :  { %271 = vrot.lane.b32.xlu0 %v1798_v7, %s1676_s8 }
 0x234   :  { %v526_v49 = vmul.f32 %v1574_v45, %v524_v48 }
 0x236   :  { %v528_v50 = vadd.f32 1.4214138, %v526_v49 }
 0x238   :  { %v530_v51 = vmul.f32 %v1574_v45, %v528_v50 }
 0x23a   :  { %v532_v52 = vadd.f32 -0.28449672, %v530_v51 }
 0x23c   :  { %v534_v53 = vmul.f32 %v1574_v45, %v532_v52 }
 0x23e   :  { %v536_v54 = vadd.f32 0.2548296, %v534_v53 }
 0x240   :  { %v538_v55 = vmul.f32 %v1574_v45, %v536_v54 }
 0x242   :  { %v548_v57 = vmul.f32 %v1576_v56, %v538_v55  ;;  %v664_v55 = vld [vmem:[%s2054_s4] sm:$0xff]  ;;  %v665_v56 = vld [vmem:[%s2054_s4 + $0x8] sm:$0xff]  ;;  %s1680_s4 = smov 1  }
 0x244   :  { %v550_v58 = vsub.f32 1.0, %v548_v57  ;;  %v670_v57 = vsub.f32 1.0, %v664_v55 }
 0x246   :  { %v554_v59 = vsub.f32 0.0, %v550_v58 }
 0x248   :  { %v556_v61 = vsel %vm552_vm5, %v550_v58, %v554_v59  ;;  %v671_v58 = vsub.f32 1.0, %v665_v56 }
 0x249   :  { %v558_v62 = vadd.f32 1.0, %v556_v61 }
 0x24b   :  { %v560_v0 = vmul.f32 0.5, %v558_v62 }
 0x24d   :  { %v562_v2 = vmax.f32 %v560_v0, 1e-12 }
 0x24f   :  { %1577 = vlog2.f32 %v562_v2 }
 0x250   :  { %1579 = vrcp.f32 %v470_v23 }
 0x25c   :  { %v1578_v7 = vpop.eup %1577 }
 0x25d   :  { %v565_v8 = vmul.f32 0.6931472, %v1578_v7  ;;  %v1580_v40 = vpop.eup %1579 }
 0x25f   :  { %1522 = vmatpush3.xpose.msk.msra.mxu1 %vm289_vm4, %v565_v8  ;;  %v568_v1 = vsel %vm289_vm4, %v565_v8, 0.0 }
 0x260   :  { %569 = vadd.xlane.f32.xlu0 %v568_v1  ;;  %1531 = vmatprep.subr.mxu1 %v1672_v24 }
 0x262   :  { %1524 = vmatmul.mubr.msk.f32.vlgmr.msra.gmra.mxu1 %vm289_vm4, %v1675_v42 }
 0x263   :  { %1532 = vmatpush3.msk.msra.mxu1 %vm71_vm0, %v1869_v9  ;;  %1533 = vmatprep.mubr.msk.f32.mxu1 %vm1673_vm3, %v1672_v24 }
 0x264   :  { %1541 = vmatprep.subr.msk.mxu1 %vm1003_vm6, %v1087_v11 }
 0x266   :  { %1534 = vmatmul.mubr.msk.f32.vlgmr.msra.gmra.mxu1 %vm64_vm1, %v914_v12 }
 0x267   :  { %1543 = vmatprep.mubr.msk.f32.mxu1 %vm289_vm4, %v1835_v31  ;;  %1542 = vmatpush3.msk.msra.mxu1 %vm1003_vm6, %v1087_v11 }
 0x26a   :  { %1544 = vmatmul.mubr.msk.f32.vlgmr.msra.gmra.mxu1 %vm289_vm4, %v1847_v36 }
 0x2a6   :  { %v375_v13 = vpop.xlane.xlu0 %374 }
 0x2aa   :  { %v272_v14 = vpop.permute.xlu0 %271  ;;  %v378_v15 = vpop.xlane.xlu1 %377 }
 0x2ab   :  { %v277_v16 = vmul.f32 %v1826_v25, %v272_v14 }
 0x2ad   :  { %281 = vrot.lane.b32.xlu1 %v277_v16, %s1674_s6 }
 0x2ae   :  { %v274_v17 = vpop.permute.xlu1 %273 }
 0x2af   :  { %v278_v19 = vmul.f32 %v1829_v27, %v274_v17 }
 0x2b1   :  { %283 = vrot.lane.b32.xlu1 %v278_v19, %s1674_s6 }
 0x2b5   :  { %731 = vrot.lane.b32.xlu1 %v1819_v20, %s1677_s11 }
 0x2de   :  { %v1515_v25 = vpop.f32.mrf.mxu0 }
 0x2df   :  { %v462_v32 = vmul.f32 2.0, %v1515_v25 }
 0x2e0   :  { %v362_v29 = vpop.f32.mrf.mxu0 }
 0x2e1   :  { %v461_v33 = vmul.f32 2.0, %v362_v29 }
 0x2e2   :  { %v451_v27 = vpop.f32.mrf.mxu0 }
 0x2e3   :  { %v458_v30 = vrot.slane %v451_v27, %v1896_v28 }
 0x2e4   :  { %v1520_v31 = vpop.f32.mrf.mxu0 }
 0x2e5   :  { %v459_v34 = vadd.f32 %v458_v30, %v375_v13  ;;  %v460_v35 = vadd.f32 %v458_v30, %v378_v15 }
 0x2e7   :  { %v463_v36 = vsub.f32 %v459_v34, %v461_v33  ;;  %v464_v37 = vsub.f32 %v460_v35, %v462_v32 }
 0x2e9   :  { %v465_v38 = vmax.f32 %v463_v36, 0.0  ;;  %v466_v39 = vmax.f32 %v464_v37, 0.0 }
 0x2eb   :  { %v467_v41 = vmul.f32 -0.5, %v465_v38  ;;  %v468_v42 = vmul.f32 -0.5, %v466_v39 }
 0x2ed   :  { %v1899_v43 = vmul.f32 %v1580_v40, %v467_v41  ;;  %v1901_v44 = vmul.f32 %v1580_v40, %v468_v42 }
 0x2ef   :  { %v474_v45 = vmax.f32 %v1899_v43, -0.6931472  ;;  %v475_v46 = vmax.f32 %v1901_v44, -0.6931472  ;;  %v476_v47 = vmin.f32 %v1899_v43, -0.6931472 }
 0x2f0   :  { %v477_v48 = vmin.f32 %v1901_v44, -0.6931472  ;;  %vm506_vm7 = vcmp.gt.f32.partialorder %v1899_v43, -0.6931472  ;;  %vm507_vm8 = vcmp.gt.f32.partialorder %v1901_v44, -0.6931472 }
 0x2f1   :  { %v478_v49 = vmul.f32 1.442695, %v476_v47  ;;  %v490_v50 = vsub.f32 0.0, %v474_v45  ;;  %v491_v51 = vsub.f32 0.0, %v475_v46 }
 0x2f2   :  { %v480_v52 = vmul.f32 1.442695, %v477_v48 }
 0x2f3   :  { %1581 = vpow2.f32 %v478_v49  ;;  %v492_v53 = vmul.f32 1.442695, %v490_v50  ;;  %v494_v54 = vmul.f32 1.442695, %v491_v51 }
 0x2f4   :  { %1583 = vpow2.f32 %v480_v52 }
 0x2f5   :  { %1585 = vpow2.f32 %v492_v53  ;;  %v570_v53 = vpop.xlane.xlu0 %569 }
 0x2f6   :  { %1587 = vpow2.f32 %v494_v54 }
 0x2f7   :  { %1589 = vlog2.f32 %v664_v55 }
 0x2f8   :  { %1591 = vlog2.f32 %v665_v56 }
 0x2f9   :  { %1593 = vlog2.f32 %v670_v57 }
 0x2fa   :  { %1595 = vlog2.f32 %v671_v58 }
 0x300   :  { %v1582_v59 = vpop.eup %1581 }
 0x301   :  { %v1584_v60 = vpop.eup %1583  ;;  %v482_v61 = vsub.f32 1.0, %v1582_v59  ;;  %v870_v59 = vmul.f32 -2.0, %v1819_v20 }
 0x302   :  { %v1586_v62 = vpop.eup %1585  ;;  %v483_v63 = vsub.f32 1.0, %v1584_v60 }
 0x303   :  { %v1588_v0 = vpop.eup %1587  ;;  %1597 = vlog2.f32 %v482_v61  ;;  %v1434_v2 = vadd.f32 -1.0, %v1586_v62  ;;  %v871_v61 = vmul.f32 -2.0, %v1817_v18  ;;  %v872_v62 = vmul.f32 1.442695, %v870_v59 }
 0x304   :  { %1599 = vlog2.f32 %v483_v63  ;;  %v1435_v3 = vadd.f32 -1.0, %v1588_v0  ;;  %v1590_v6 = vpop.eup %1589 }
 0x305   :  { %v498_v4 = vmax.f32 %v1434_v2, 1e-20  ;;  %v1592_v7 = vpop.eup %1591  ;;  %v667_v12 = vmul.f32 0.6931472, %v1590_v6  ;;  %v874_v63 = vmul.f32 1.442695, %v871_v61 }
 0x306   :  { %v499_v5 = vmax.f32 %v1435_v3, 1e-20  ;;  %v1594_v8 = vpop.eup %1593  ;;  %v669_v15 = vmul.f32 0.6931472, %v1592_v7 }
 0x307   :  { %1601 = vlog2.f32 %v498_v4  ;;  %v1596_v10 = vpop.eup %1595  ;;  %v673_v13 = vmul.f32 0.6931472, %v1594_v8 }
 0x308   :  { %1603 = vlog2.f32 %v499_v5  ;;  %v675_v16 = vmul.f32 0.6931472, %v1596_v10 }
 0x309   :  { %v676_v26 = vsub.f32 %v667_v12, %v673_v13  ;;  %v1441_v12 = vld [vmem:[%s2060_s10] ss:$0 sm:$0xff] }
 0x30a   :  { %v677_v27 = vsub.f32 %v669_v15, %v675_v16 }
 0x310   :  { %v1598_v1 = vpop.eup %1597 }
 0x311   :  { %v1600_v11 = vpop.eup %1599  ;;  %v485_v14 = vmul.f32 0.6931472, %v1598_v1 }
 0x312   :  { %v487_v19 = vmul.f32 0.6931472, %v1600_v11  ;;  %v1440_v11 = vld [vmem:[%s2059_s9] ss:$0 sm:$0xff] }
 0x313   :  { %v488_v25 = vsub.f32 %v476_v47, %v485_v14 }
 0x314   :  { %v1602_v17 = vpop.eup %1601  ;;  %v489_v30 = vsub.f32 %v477_v48, %v487_v19 }
 0x315   :  { %v1604_v21 = vpop.eup %1603  ;;  %v501_v22 = vmul.f32 0.6931472, %v1602_v17  ;;  %v998_v17 = vrot.slane %v1869_v9, 4  ;;  %v1181_v9 = vld [vmem:[%s2063_s13 + $0x18] sm:$0xff] }
 0x316   :  { %v503_v23 = vmul.f32 0.6931472, %v1604_v21 }
 0x317   :  { %v504_v29 = vsub.f32 0.0, %v501_v22 }
 0x318   :  { %v505_v31 = vsub.f32 0.0, %v503_v23 }
 0x319   :  { %v508_v32 = vsel %vm506_vm7, %v504_v29, %v488_v25  ;;  %v1180_v25 = vld [vmem:[%s2063_s13 + $0x10] sm:$0xff]  ;;  %v1179_v29 = vld [vmem:[%s2063_s13 + $0x8] sm:$0xff] }
 0x31a   :  { %v509_v33 = vsel %vm507_vm8, %v505_v31, %v489_v30  ;;  %v678_v34 = vadd.f32 %v676_v26, %v508_v32 }
 0x31b   :  { %v679_v35 = vadd.f32 %v677_v27, %v509_v33  ;;  %v1178_v27 = vld [vmem:[%s2063_s13] sm:$0xff] }
 0x31c   :  { %v680_v36 = vsub.f32 0.0, %v678_v34 }
 0x31d   :  { %v681_v37 = vsub.f32 0.0, %v679_v35 }
 0x31e   :  { %v683_v38 = vmul.f32 3.3333333, %v680_v36 }
 0x31f   :  { %v684_v39 = vmul.f32 3.3333333, %v681_v37  ;;  %v282_v40 = vpop.permute.xlu1 %281 }
 0x320   :  { %v685_v41 = vmul.f32 1.442695, %v683_v38  ;;  %v1916_v42 = vadd.f32 %v282_v40, %v1819_v20 }
 0x321   :  { %v687_v45 = vmul.f32 1.442695, %v684_v39 }
 0x322   :  { %1605 = vpow2.f32 %v685_v41  ;;  %v643_v46 = vpop.f32.mrf.mxu1  ;;  %994 = vrot.lane.b32.xlu1 %v1916_v42, %s1677_s11  ;;  %v1456_v41 = vld [vmem:[%s2062_s12] ss:$0 sm:$0xff] }
 0x323   :  { %1607 = vpow2.f32 %v687_v45  ;;  %v653_v52 = vrot.slane %v643_v46, %v1896_v28  ;;  %v284_v0 = vpop.permute.xlu1 %283 }
 0x324   :  { %v1525_v43 = vpop.f32.mrf.mxu1  ;;  %v1929_v2 = vadd.f32 %v284_v0, %v1817_v18 }
 0x325   :  { %vm654_vm9 = vcmp.lt.f32.partialorder %v570_v53, %v653_v52 }
 0x326   :  { %v1920_v44 = vpop.f32.mrf.mxu1  ;;  %v1438_v56 = vsel %vm654_vm9, 1.0, %v1672_v24  ;;  %v1934_v24 = vld [vmem:[%s2052_s2] sm:$0xff] }
 0x327   :  { %v732_v5 = vpop.permute.xlu1 %731  ;;  %v1084_v31 = vrot.slane %v1920_v44, %v1896_v28 }
 0x328   :  { %v1535_v47 = vpop.f32.mrf.mxu1 }
 0x329   :  { %v865_v47 = vsub.f32 %v1929_v2, %v1817_v18 }
 0x32a   :  { %v1545_v36 = vpop.f32.mrf.mxu1 }
 0x32b   :  { %v867_v53 = vmul.f32 0.5, %v865_v47 }
 0x32c   :  { %v1156_v46 = vpop.f32.mrf.mxu1 }
 0x32f   :  { %v1606_v48 = vpop.eup %1605 }
 0x330   :  { %v1608_v49 = vpop.eup %1607  ;;  %v689_v50 = vadd.f32 1.0, %v1606_v48 }
 0x331   :  { %v690_v51 = vadd.f32 1.0, %v1608_v49 }
 0x332   :  { %1609 = vrcp.f32 %v689_v50  ;;  %v864_v50 = vsub.f32 %v1916_v42, %v1819_v20 }
 0x333   :  { %1611 = vrcp.f32 %v690_v51 }
 0x334   :  { %1613 = vpow2.f32 %v872_v62 }
 0x335   :  { %1615 = vpow2.f32 %v874_v63 }
 0x33f   :  { %v1610_v54 = vpop.eup %1609 }
 0x340   :  { %v1612_v55 = vpop.eup %1611  ;;  %v692_v58 = vmul.f32 %v1610_v54, %v1438_v56  ;;  %v866_v54 = vmul.f32 0.5, %v864_v50 }
 0x341   :  { %v699_v57 = vsel %vm695_vm10, %v1612_v55, 0.0  ;;  %v1614_v3 = vpop.eup %1613 }
 0x342   :  { %700 = vadd.xlane.f32.xlu0 %v699_v57  ;;  %v696_v60 = vsel %vm695_vm10, %v692_v58, 0.0  ;;  %v1616_v4 = vpop.eup %1615  ;;  %v869_v57 = vmul.f32 %v867_v53, %v865_v47  ;;  %v868_v59 = vmul.f32 %v866_v54, %v864_v50 }
 0x346   :  { %697 = vadd.xlane.f32.xlu1 %v696_v60 }
 0x357   :  { %996 = vrot.lane.b32.xlu1 %v1929_v2, %s1677_s11 }
 0x358   :  { %712 = vperm.xlu0 %1568, %v1934_v24  }
 0x35b   :  { %878 = vrot.lane.b32.xlu1 %v1614_v3, %s1674_s6 }
 0x35f   :  { %880 = vrot.lane.b32.xlu1 %v1616_v4, %s1674_s6 }
 0x394   :  { %v995_v6 = vpop.permute.xlu1 %994 }
 0x3cb   :  { %v701_v7 = vpop.xlane.xlu0 %700 }
 0x3cc   :  { %v703_v8 = vadd.f32 1e-08, %v701_v7  ;;  %v861_v7 = vsub.f32 0.0, %v1817_v18  ;;  %v1457_v18 = vld [vmem:[%s2064_s14] ss:$0 sm:$0xff] }
 0x3ce   :  { %1617 = vrcp.f32 %v703_v8 }
 0x3cf   :  { %v698_v10 = vpop.xlane.xlu1 %697 }
 0x3d0   :  { %v702_v1 = vadd.f32 1e-08, %v698_v10 }
 0x3d2   :  { %1619 = vrcp.f32 %v702_v1 }
 0x3d3   :  { %v713_v13 = vpop.permute.xlu0 %712  ;;  %v997_v26 = vpop.permute.xlu1 %996 }
 0x3d4   :  { %v721_v14 = vmul.f32 %v1440_v11, %v713_v13  ;;  %v860_v11 = vsub.f32 0.0, %v1819_v20 }
 0x3d6   :  { %v729_v15 = vadd.f32 %v1441_v12, %v721_v14  ;;  %v1447_v14 = vadd.f32 -0.9189385, %v861_v7 }
 0x3d7   :  { %v879_v49 = vpop.permute.xlu1 %878 }
 0x3d8   :  { %v734_v16 = vadd.f32 %v732_v5, %v729_v15  ;;  %v884_v61 = vmul.f32 %v879_v49, %v868_v59 }
 0x3da   :  { %1526 = vmatprep.subr.mxu0 %v734_v16 }
 0x3db   :  { %1527 = vmatpush3.msra.mxu0 %v734_v16  ;;  %v1618_v19 = vpop.eup %1617  ;;  %v881_v56 = vpop.permute.xlu1 %880 }
 0x3dc   :  { %1536 = vmatprep.subr.msk.mxu0 %vm1003_vm6, %v998_v17  ;;  %v707_v23 = vmul.f32 %v1618_v19, %v1612_v55  ;;  %v885_v60 = vmul.f32 %v881_v56, %v869_v57 }
 0x3df   :  { %v1620_v21 = vpop.eup %1619 }
 0x3e0   :  { %v705_v22 = vmul.f32 %v1620_v21, %v692_v58 }
 0x3e2   :  { %1528 = vmatprep.mubr.msk.f32.mxu0 %vm695_vm10, %v705_v22 }
 0x3e3   :  { %1529 = vmatmul.mubr.msk.f32.vlgmr.msra.gmra.mxu0 %vm695_vm10, %v707_v23 }
 0x3e4   :  { %1537 = vmatpush3.msk.msra.mxu0 %vm1003_vm6, %v998_v17  ;;  %1538 = vmatprep.mubr.msk.f32.mxu0 %vm289_vm4, %v995_v6 }
 0x3e5   :  { %1546 = vmatprep.subr.mxu0 %v1181_v9 }
 0x3e7   :  { %1539 = vmatmul.mubr.msk.f32.vlgmr.msra.gmra.mxu0 %vm289_vm4, %v997_v26 }
 0x3e8   :  { %1547 = vmatpush3.msra.mxu0 %v1181_v9 }
 0x3e9   :  { %1548 = vmatprep.subr.mxu0 %v1180_v25 }
 0x3ea   :  { %1549 = vmatpush3.msra.mxu0 %v1180_v25 }
 0x3eb   :  { %1550 = vmatprep.subr.mxu0 %v1179_v29 }
 0x3ec   :  { %1551 = vmatpush3.msra.mxu0 %v1179_v29 }
 0x3ed   :  { %1552 = vmatprep.subr.mxu0 %v1178_v27 }
 0x3ee   :  { %1553 = vmatpush3.msra.mxu0 %v1178_v27 }
 0x4a3   :  { %v1966_v30 = vpop.f32.mrf.mxu0 }
 0x4a4   :  { %v835_v32 = vmul.f32 -2.0, %v1966_v30  ;;  %824 = vrot.lane.b32.xlu0 %v1966_v30, %s1676_s8 }
 0x4a5   :  { %v1973_v33 = vpop.f32.mrf.mxu0 }
 0x4a6   :  { %v838_v34 = vmul.f32 1.442695, %v835_v32  ;;  %v834_v35 = vmul.f32 -2.0, %v1973_v33  ;;  %822 = vrot.lane.b32.xlu1 %v1973_v33, %s1676_s8 }
 0x4a7   :  { %v1540_v37 = vpop.f32.mrf.mxu0 }
 0x4a8   :  { %1621 = vpow2.f32 %v838_v34  ;;  %v836_v38 = vmul.f32 1.442695, %v834_v35  ;;  %v1086_v39 = vadd.f32 %v1540_v37, %v1084_v31 }
 0x4a9   :  { %v1072_v40 = vpop.f32.mrf.mxu0 }
 0x4aa   :  { %1623 = vpow2.f32 %v836_v38  ;;  %v1166_v28 = vadd.f32 %v1545_v36, %v1086_v39  ;;  %v1085_v45 = vadd.f32 %v1084_v31, %v1072_v40 }
 0x4ac   :  { %v1165_v43 = vadd.f32 %v1156_v46, %v1085_v45  ;;  %v1175_v44 = vadd.f32 %v1456_v41, %v1166_v28 }
 0x4ae   :  { %v1174_v48 = vadd.f32 %v1456_v41, %v1165_v43  ;;  %v1177_v52 = vmax.f32 %v1175_v44, 0.0 }
 0x4b0   :  { %v1176_v51 = vmax.f32 %v1174_v48, 0.0  ;;  %v817_v48 = vsub.f32 0.0, %v1966_v30 }
 0x4b2   :  { %1554 = vmatprep.mubr.msk.f32.mxu0 %vm163_vm2, %v1176_v51  ;;  %v1445_v56 = vadd.f32 -0.9189385, %v817_v48 }
 0x4b3   :  { %1555 = vmatmul.mubr.msk.f32.vlgmr.msra.gmra.mxu0 %vm163_vm2, %v1177_v52  ;;  %v816_v52 = vsub.f32 0.0, %v1973_v33 }
 0x4b5   :  { %v1622_v55 = vpop.eup %1621 }
 0x4b6   :  { %844 = vrot.lane.b32.xlu0 %v1622_v55, %s1671_s20 }
 0x4b7   :  { %v1624_v58 = vpop.eup %1623 }
 0x4b8   :  { %842 = vrot.lane.b32.xlu1 %v1624_v58, %s1671_s20 }
 0x4ba   :  { %890 = vrot.lane.b32.xlu0 %v885_v60, %s1671_s20 }
 0x4bc   :  { %888 = vrot.lane.b32.xlu1 %v884_v61, %s1671_s20  ;;  %v1444_v61 = vadd.f32 -0.9189385, %v816_v52 }
 0x516   :  { %v825_v62 = vpop.permute.xlu0 %824 }
 0x517   :  { %v829_v0 = vsub.f32 %v1929_v2, %v825_v62 }
 0x518   :  { %v823_v63 = vpop.permute.xlu1 %822 }
 0x519   :  { %v828_v3 = vsub.f32 %v1916_v42, %v823_v63  ;;  %v831_v4 = vmul.f32 0.5, %v829_v0  ;;  %v1446_v42 = vadd.f32 -0.9189385, %v860_v11 }
 0x51b   :  { %v830_v5 = vmul.f32 0.5, %v828_v3  ;;  %v833_v6 = vmul.f32 %v831_v4, %v829_v0 }
 0x51d   :  { %v832_v1 = vmul.f32 %v830_v5, %v828_v3 }
 0x528   :  { %v845_v8 = vpop.permute.xlu0 %844 }
 0x529   :  { %v849_v10 = vmul.f32 %v845_v8, %v833_v6 }
 0x52a   :  { %v843_v12 = vpop.permute.xlu1 %842 }
 0x52b   :  { %v848_v13 = vmul.f32 %v843_v12, %v832_v1  ;;  %854 = vrot.lane.b32.xlu0 %v849_v10, %s1674_s6 }
 0x52c   :  { %v891_v15 = vpop.permute.xlu0 %890 }
 0x52d   :  { %v895_v16 = vsub.f32 %v1447_v14, %v891_v15  ;;  %852 = vrot.lane.b32.xlu1 %v848_v13, %s1674_s6 }
 0x52e   :  { %v889_v2 = vpop.permute.xlu1 %888 }
 0x52f   :  { %v894_v17 = vsub.f32 %v1446_v42, %v889_v2  ;;  %900 = vrot.lane.b32.xlu0 %v895_v16, %s1677_s11  ;;  %v1313_v2 = vld [vmem:[%s2052_s2 + $0x8] sm:$0xff]  ;;  %s1681_s2 = smov [#allocation3]  }
 0x530   :  { %s1412_s17 = sshll.u32 %s1681_s2, 4  ;;  %s1413_s17 = int_to_ptr.vmem [resolvable:$true] %s1412_s17 }
 0x531   :  { %898 = vrot.lane.b32.xlu1 %v894_v17, %s1677_s11  ;;  %s1649_s18 = scalar_lea.vmem %s1413_s17, 16  ;;  %s1653_s19 = scalar_lea.vmem %s1413_s17, 32 }
 0x532   :  { %p1650_p0 = scmp.ne.s32.totalorder %s1413_s17, %s1649_s18  ;;  %p1654_p1 = scmp.lt.s32.totalorder %s1413_s17, %s1413_s17 }
 0x533   :  { %p1655_p2 = scmp.lt.s32.totalorder %s1653_s19, %s1649_s18 }
 0x535   :  { %p1656_p3 = por %p1655_p2, %p1654_p1 }
 0x537   :  { %p1657_p4 = pnand %p1656_p3, %p1650_p0 }
 0x573   :  { %v1556_v20 = vpop.f32.mrf.mxu0 }
 0x574   :  { %v2002_v19 = vadd.f32 %v1556_v20, %v1457_v18 }
 0x575   :  { %v1261_v21 = vpop.f32.mrf.mxu0 }
 0x576   :  { %v1273_v22 = vsub.f32 0.0, %v2002_v19  ;;  %v1288_v23 = vmul.f32 1.442695, %v2002_v19  ;;  %v2006_v26 = vadd.f32 %v1457_v18, %v1261_v21  ;;  %1308 = vst.msk [vmem:[%s2065_s15 + $0x8] sm:$0xff] %vm1306_vm11, %v2002_v19  ;;  %vm1271_vm12 = vcmp.gt.f32.partialorder %v2002_v19, 0.0 }
 0x577   :  { %v1319_v17 = vsub.f32 %v1313_v2, %v2002_v19 }
 0x578   :  { %v1276_v9 = vmul.f32 1.442695, %v1273_v22  ;;  %1625 = vpow2.f32 %v1288_v23  ;;  %v1272_v25 = vsub.f32 0.0, %v2006_v26  ;;  %1307 = vst.msk [vmem:[%s2065_s15] sm:$0xff] %vm1306_vm11, %v2006_v26  ;;  %v1286_v29 = vmul.f32 1.442695, %v2006_v26 }
 0x579   :  { %vm1270_vm13 = vcmp.gt.f32.partialorder %v2006_v26, 0.0  ;;  %v1318_v18 = vsub.f32 %v1934_v24, %v2006_v26  ;;  %v1321_v20 = vmul.f32 0.5, %v1319_v17 }
 0x57a   :  { %1627 = vpow2.f32 %v1276_v9  ;;  %v1274_v27 = vmul.f32 1.442695, %v1272_v25 }
 0x57b   :  { %1629 = vpow2.f32 %v1286_v29  ;;  %v1320_v21 = vmul.f32 0.5, %v1318_v18  ;;  %v1323_v22 = vmul.f32 %v1321_v20, %v1319_v17 }
 0x57c   :  { %1631 = vpow2.f32 %v1274_v27 }
 0x57d   :  { %v1322_v25 = vmul.f32 %v1320_v21, %v1318_v18 }
 0x585   :  { %v1626_v31 = vpop.eup %1625 }
 0x586   :  { %v1291_v32 = vadd.f32 1.0, %v1626_v31 }
 0x587   :  { %v1628_v34 = vpop.eup %1627 }
 0x588   :  { %v1630_v35 = vpop.eup %1629  ;;  %v1279_v36 = vadd.f32 1.0, %v1628_v34  ;;  %1633 = vlog2.f32 %v1291_v32 }
 0x589   :  { %v1632_v37 = vpop.eup %1631  ;;  %v1290_v38 = vadd.f32 1.0, %v1630_v35 }
 0x58a   :  { %1635 = vlog2.f32 %v1279_v36  ;;  %v1278_v39 = vadd.f32 1.0, %v1632_v37 }
 0x58b   :  { %1637 = vlog2.f32 %v1290_v38 }
 0x58c   :  { %1639 = vlog2.f32 %v1278_v39 }
 0x595   :  { %v1634_v40 = vpop.eup %1633 }
 0x596   :  { %v1295_v44 = vmul.f32 0.6931472, %v1634_v40 }
 0x597   :  { %v1636_v28 = vpop.eup %1635 }
 0x598   :  { %v1638_v41 = vpop.eup %1637  ;;  %v1283_v45 = vmul.f32 0.6931472, %v1636_v28 }
 0x599   :  { %v1640_v46 = vpop.eup %1639  ;;  %v1293_v51 = vmul.f32 0.6931472, %v1638_v41 }
 0x59a   :  { %v1285_v43 = vadd.f32 %v1283_v45, %v2002_v19  ;;  %v1281_v47 = vmul.f32 0.6931472, %v1640_v46 }
 0x59c   :  { %v1297_v49 = vsel %vm1271_vm12, %v1285_v43, %v1295_v44  ;;  %v1284_v50 = vadd.f32 %v1281_v47, %v2006_v26 }
 0x59d   :  { %v1299_v53 = vmul.f32 0.9, %v1297_v49  ;;  %v855_v54 = vpop.permute.xlu0 %854 }
 0x59e   :  { %v1296_v55 = vsel %vm1270_vm13, %v1284_v50, %v1293_v51  ;;  %v859_v60 = vsub.f32 %v1445_v56, %v855_v54 }
 0x59f   :  { %v1301_v57 = vadd.f32 0.1, %v1299_v53  ;;  %v1298_v58 = vmul.f32 0.9, %v1296_v55  ;;  %v853_v59 = vpop.permute.xlu1 %852 }
 0x5a0   :  { %v858_v63 = vsub.f32 %v1444_v61, %v853_v59 }
 0x5a1   :  { %1641 = vlog2.f32 %v1301_v57  ;;  %v1300_v30 = vadd.f32 0.1, %v1298_v58  ;;  %v901_v62 = vpop.permute.xlu0 %900 }
 0x5a2   :  { %v905_v0 = vsub.f32 %v859_v60, %v901_v62 }
 0x5a3   :  { %1643 = vlog2.f32 %v1300_v30  ;;  %v899_v3 = vpop.permute.xlu1 %898 }
 0x5a4   :  { %v904_v4 = vsub.f32 %v858_v63, %v899_v3  ;;  %1364 = vrot.lane.b32.xlu0 %v905_v0, %s1674_s6 }
 0x5a6   :  { %1351 = vrot.lane.b32.xlu1 %v904_v4, %s1674_s6  ;;  %s1679_s6 = smov 127  }
 0x5ae   :  { %v1642_v33 = vpop.eup %1641 }
 0x5af   :  { %v1305_v5 = vmul.f32 0.6931472, %v1642_v33 }
 0x5b0   :  { %v1644_v6 = vpop.eup %1643 }
 0x5b1   :  { %v1325_v7 = vmul.f32 -2.0, %v1305_v5  ;;  %v1303_v8 = vmul.f32 0.6931472, %v1644_v6  ;;  %1311 = vst.msk [vmem:[%s2065_s15 + $0x8] sm:$0xff] %vm1309_vm14, %v1305_v5  ;;  %v1315_v35 = vsub.f32 0.0, %v1305_v5 }
 0x5b3   :  { %v1328_v10 = vmul.f32 1.442695, %v1325_v7  ;;  %v1324_v1 = vmul.f32 -2.0, %v1303_v8  ;;  %1310 = vst.msk [vmem:[%s2065_s15] sm:$0xff] %vm1309_vm14, %v1303_v8  ;;  %v1314_v19 = vsub.f32 0.0, %v1303_v8 }
 0x5b4   :  { %v1461_v38 = vadd.f32 -0.9189385, %v1315_v35 }
 0x5b5   :  { %v1326_v11 = vmul.f32 1.442695, %v1324_v1  ;;  %1645 = vpow2.f32 %v1328_v10  ;;  %v1460_v40 = vadd.f32 -0.9189385, %v1314_v19 }
 0x5b7   :  { %1647 = vpow2.f32 %v1326_v11 }
 0x5c2   :  { %v1646_v12 = vpop.eup %1645 }
 0x5c3   :  { %1334 = vrot.lane.b32.xlu0 %v1646_v12, %s1679_s6 }
 0x5c4   :  { %v1648_v13 = vpop.eup %1647 }
 0x5c5   :  { %1332 = vrot.lane.b32.xlu1 %v1648_v13, %s1679_s6 }
 0x616   :  { %v1365_v14 = vpop.permute.xlu0 %1364 }
 0x617   :  { %v1367_v15 = vsel %vm289_vm4, %v1365_v14, 0.0 }
 0x618   :  { %1368 = vadd.xlane.f32.xlu0 %v1367_v15  ;;  %v1352_v16 = vpop.permute.xlu1 %1351 }
 0x619   :  { %v1354_v42 = vsel %vm289_vm4, %v1352_v16, 0.0 }
 0x61a   :  { %1355 = vadd.xlane.f32.xlu1 %v1354_v42 }
 0x635   :  { %v1335_v23 = vpop.permute.xlu0 %1334 }
 0x636   :  { %v1339_v9 = vmul.f32 %v1335_v23, %v1323_v22 }
 0x637   :  { %v1333_v29 = vpop.permute.xlu1 %1332 }
 0x638   :  { %v1338_v27 = vmul.f32 %v1333_v29, %v1322_v25  ;;  %1344 = vrot.lane.b32.xlu1 %v1339_v9, %s1680_s4 }
 0x63a   :  { %1342 = vrot.lane.b32.xlu0 %v1338_v27, %s1680_s4 }
 0x6a1   :  { %v1369_v31 = vpop.xlane.xlu0 %1368 }
 0x6a2   :  { %v1370_v34 = vrot.slane %v1369_v31, 4 }
 0x6a3   :  { %v1356_v32 = vpop.xlane.xlu1 %1355 }
 0x6a4   :  { %v1357_v36 = vrot.slane %v1356_v32, 4  ;;  %v1371_v37 = vadd.f32 %v1370_v34, %v1369_v31 }
 0x6a6   :  { %v1358_v24 = vadd.f32 %v1357_v36, %v1356_v32  ;;  %v1372_v28 = vrot.slane %v1371_v37, 2 }
 0x6a8   :  { %v1359_v43 = vrot.slane %v1358_v24, 2  ;;  %v1373_v48 = vadd.f32 %v1372_v28, %v1371_v37 }
 0x6aa   :  { %v1345_v26 = vpop.permute.xlu1 %1344  ;;  %v1360_v51 = vadd.f32 %v1359_v43, %v1358_v24  ;;  %v1374_v54 = vrot.slane %v1373_v48, 1 }
 0x6ab   :  { %v1349_v39 = vsub.f32 %v1461_v38, %v1345_v26 }
 0x6ac   :  { %v1343_v41 = vpop.permute.xlu0 %1342  ;;  %v1361_v57 = vrot.slane %v1360_v51, 1  ;;  %v1375_v60 = vadd.f32 %v1374_v54, %v1373_v48 }
 0x6ad   :  { %v1385_v45 = vsel %vm1309_vm14, %v1349_v39, 0.0  ;;  %v1348_v46 = vsub.f32 %v1460_v40, %v1343_v41 }
 0x6ae   :  { %v1386_v44 = vrot.slane %v1385_v45, 4  ;;  %v1362_v62 = vadd.f32 %v1361_v57, %v1360_v51 }
 0x6af   :  { %v1377_v47 = vsel %vm1309_vm14, %v1348_v46, 0.0 }
 0x6b0   :  { %v1387_v49 = vadd.f32 %v1386_v44, %v1385_v45  ;;  %v1378_v50 = vrot.slane %v1377_v47, 4 }
 0x6b2   :  { %v1388_v52 = vrot.slane %v1387_v49, 2  ;;  %v1379_v53 = vadd.f32 %v1378_v50, %v1377_v47 }
 0x6b4   :  { %v1389_v55 = vadd.f32 %v1388_v52, %v1387_v49  ;;  %v1380_v56 = vrot.slane %v1379_v53, 2 }
 0x6b6   :  { %v1390_v58 = vrot.slane %v1389_v55, 1  ;;  %v1381_v59 = vadd.f32 %v1380_v56, %v1379_v53 }
 0x6b8   :  { %v1391_v61 = vadd.f32 %v1390_v58, %v1389_v55  ;;  %v1382_v30 = vrot.slane %v1381_v59, 1 }
 0x6ba   :  { %v1383_v63 = vadd.f32 %v1382_v30, %v1381_v59  ;;  %v1394_v0 = vadd.f32 %v1391_v61, %v1375_v60 }
 0x6bc   :  { %v1392_v3 = vadd.f32 %v1383_v63, %v1362_v62  ;;  %v1395_v33 = vmul.f32 0.125, %v1394_v0 }
 0x6be   :  { %v1393_v4 = vmul.f32 0.125, %v1392_v3 }
 0x6c0   :  { %v1396_v5 = vadd.f32 %v1395_v33, %v1393_v4 }
 0x6c2   :  { %v1397_v6 = vsub.f32 0.0, %v1396_v5 }
 0x6c4   :  { %1399 = vrot.lane.b32.xlu1 %v1397_v6, %s1679_s6 }
 0x736   :  { %v1400_v7 = vpop.permute.xlu1 %1399 }
 0x737   :  { %1403 = vst.msk [vmem:[#allocation3] sm:$0x1] %vm1402_vm15, %v1400_v7 }
 0x738   :  { %1660 = shalt.err (!%p1657_p4)
}
 0x739   :  { %1415 = dma.vmem_to_hbm [thread:$0]  %s1413_s17, 16, %s2066_s16, [#allocation4]  }
 0x73a   :  { %1669 = dma.done.wait [#allocation4], 16  }
 0x73b   :  { %1670 = vsyncadd [#allocation4], 4294967280 }
 0x73c   :  { %1421 = vsyncpa [#allocation4], 1 }

</bundles_post_ra>
